<compile_context>
chip_gen: v6e
topology: v6e:2x2x1
jax: 0.10.0
libtpu: 0.0.40
codegen_flags: <defaults>
</compile_context>

<pallas_src>
import jax
import jax.numpy as jnp
from jax import lax
from jax.experimental import pallas as pl
from jax.experimental.pallas import tpu as pltpu

LANES = 128


# ---------------------------------------------------------------------------
# In-kernel vector helpers (operate on (BR, 128) planes, pure elementwise VPU/EUP ops)
# ---------------------------------------------------------------------------
def _norm3(vx, vy, vz):
    # normalise(v) = v / ||v||, via rsqrt + mul (EUP + VPU instead of sqrt + 3 divides)
    inv = lax.rsqrt(vx * vx + vy * vy + vz * vz)
    return vx * inv, vy * inv, vz * inv


def _cross3(ax, ay, az, bx, by, bz):
    return ay * bz - az * by, az * bx - ax * bz, ax * by - ay * bx


def _rotate3(vx, vy, vz, ux, uy, uz, cosA, sinA):
    # R v with R = cosA*I + sinA*[u]_x + (1 - cosA) * u u^T   (Rodrigues; identical to the torch
    # construction cosA*I + sinA*cross + (1-cosA)*outer applied via einsum('bij,bj->bi'))
    udotv = ux * vx + uy * vy + uz * vz
    cx, cy, cz = _cross3(ux, uy, uz, vx, vy, vz)
    k = 1.0 - cosA
    return (cosA * vx + sinA * cx + k * udotv * ux,
            cosA * vy + sinA * cy + k * udotv * uy,
            cosA * vz + sinA * cz + k * udotv * uz)


def _orthogonalise3(sx, sy, sz, rx, ry, rz):
    # source - (dot(source, ref) / ||ref||) * ref   (exactly the torch helper, incl. /||ref||)
    dot = sx * rx + sy * ry + sz * rz
    c = dot * lax.rsqrt(rx * rx + ry * ry + rz * rz)
    return sx - c * rx, sy - c * ry, sz - c * rz


# ---------------------------------------------------------------------------
# Pallas kernel: one grid iteration == T_CHUNK simulation time steps for one batch tile
#   frames_ref : (12, BR, 128)          rows 0-2 = x, 3-5 = e0, 6-8 = e1, 9-11 = e2
#   params_ref : (T_CHUNK, 3, BR, 128)  channel 0 = speeds, 1 = planar, 2 = nonplanar angles
#   X_ref      : (T_CHUNK, 3, BR, 128)  trajectory output for this chunk
#   state_s    : (12, BR, 128) VMEM     state carried across time-chunks
# ---------------------------------------------------------------------------
def particle_chunk_kernel(frames_ref, params_ref, X_ref, state_s):
    t_chunk = params_ref.shape[0]

    # Initialise the carried particle state from the inputs on the first chunk of each batch tile.
    @pl.when(pl.program_id(1) == 0)
    def _():
        state_s[...] = frames_ref[...]

    # Chunk-level load of the carried state into registers.
    init = tuple(state_s[i] for i in range(12))

    def body(t, carry):
        xx, xy, xz, e0x, e0y, e0z, e1x, e1y, e1z, e2x, e2y, e2z = carry

        s = params_ref[t, 0]          # speeds            (BR, 128)
        ap = params_ref[t, 1]         # planar angles
        an = params_ref[t, 2]         # nonplanar angles

        # --- _rotate_frames(planar_angles, 'planar'): axis u = e2, rotates e0 AND e1 ---
        cosA, sinA = jnp.cos(ap), jnp.sin(ap)
        n0x, n0y, n0z = _norm3(*_rotate3(e0x, e0y, e0z, e2x, e2y, e2z, cosA, sinA))
        e1x, e1y, e1z = _norm3(*_rotate3(e1x, e1y, e1z, e2x, e2y, e2z, cosA, sinA))
        e0x, e0y, e0z = n0x, n0y, n0z
        e1x, e1y, e1z = _norm3(*_orthogonalise3(e1x, e1y, e1z, e0x, e0y, e0z))
        e2x, e2y, e2z = _norm3(*_cross3(e0x, e0y, e0z, e1x, e1y, e1z))

        # --- _rotate_frames(nonplanar_angles, 'nonplanar'): axis u = e1, rotates e0 only ---
        cosA, sinA = jnp.cos(an), jnp.sin(an)
        e0x, e0y, e0z = _norm3(*_rotate3(e0x, e0y, e0z, e1x, e1y, e1z, cosA, sinA))
        e1x, e1y, e1z = _norm3(*_orthogonalise3(e1x, e1y, e1z, e0x, e0y, e0z))
        e2x, e2y, e2z = _norm3(*_cross3(e0x, e0y, e0z, e1x, e1y, e1z))

        # --- x += speeds[:, None] * e0 ---
        xx = xx + s * e0x
        xy = xy + s * e0y
        xz = xz + s * e0z

        # record trajectory X[:, i] = x
        X_ref[t, 0, :, :] = xx
        X_ref[t, 1, :, :] = xy
        X_ref[t, 2, :, :] = xz

        return (xx, xy, xz, e0x, e0y, e0z, e1x, e1y, e1z, e2x, e2y, e2z)

    final = lax.fori_loop(0, t_chunk, body, init)

    # Chunk-level writeback of the carried state for the next chunk.
    for i in range(12):
        state_s[i] = final[i]


# ---------------------------------------------------------------------------
# Wrapper: pads batch to lane-dense (R, 128) planes, packs params, chunks time.
# ---------------------------------------------------------------------------
def simulate(x0, e0, e1, e2, speeds, planar_angles, nonplanar_angles, *, t_chunk=32):
    """Runs the full forward() time loop on TPU. Inputs are in torch layout:
    x0/e0/e1/e2: (B, 3); speeds/planar/nonplanar: (B, n_steps). Returns X: (B, n_steps, 3)."""
    f32 = jnp.float32
    B, n_steps = speeds.shape

    # --- batch padding: lane-dense last dim, batch tiled as (R, 128) planes ---
    Bp = ((B + LANES - 1) // LANES) * LANES
    R = Bp // LANES
    BR = 8 if (R >= 8 and R % 8 == 0) else R          # sublane-filled batch-row tile when possible
    n_btiles = R // BR

    # --- time chunking ---
    Tc = max(1, min(t_chunk, n_steps))
    n_chunks = -(-n_steps // Tc)
    Tp = n_chunks * Tc

    # frames: (12, R, 128). Padded lanes get a valid orthonormal frame so no NaN/Inf is generated.
    def _pad_frame(v, fill):
        v = jnp.asarray(v, f32)
        if Bp > B:
            pad = jnp.broadcast_to(jnp.asarray(fill, f32)[None, :], (Bp - B, 3))
            v = jnp.concatenate([v, pad], axis=0)
        return v.T                                     # (3, Bp)

    frames = jnp.concatenate([_pad_frame(x0, [0., 0., 0.]),
                              _pad_frame(e0, [1., 0., 0.]),
                              _pad_frame(e1, [0., 1., 0.]),
                              _pad_frame(e2, [0., 0., 1.])], axis=0).reshape(12, R, LANES)

    # params packed into one stream: (Tp, 3, R, 128). Padded lanes/steps get zeros (identity
    # rotation, zero speed), so padded work is a numerical no-op and is sliced away afterwards.
    def _pad_param(p):
        p = jnp.asarray(p, f32)
        p = jnp.pad(p, ((0, Bp - B), (0, Tp - n_steps)))
        return p.T                                     # (Tp, Bp)

    params = jnp.stack([_pad_param(speeds),
                        _pad_param(planar_angles),
                        _pad_param(nonplanar_angles)], axis=1).reshape(Tp, 3, R, LANES)

    frames_spec = pl.BlockSpec((12, BR, LANES), lambda b, c: (0, b, 0))
    params_spec = pl.BlockSpec((Tc, 3, BR, LANES), lambda b, c: (c, 0, b, 0))
    out_spec = pl.BlockSpec((Tc, 3, BR, LANES), lambda b, c: (c, 0, b, 0))

    X_t = pl.pallas_call(
        particle_chunk_kernel,
        out_shape=jax.ShapeDtypeStruct((Tp, 3, R, LANES), f32),
        grid_spec=pltpu.PrefetchScalarGridSpec(
            num_scalar_prefetch=0,
            grid=(n_btiles, n_chunks),
            in_specs=[frames_spec, params_spec],
            out_specs=out_spec,
            scratch_shapes=[pltpu.VMEM((12, BR, LANES), f32)],   # carried particle state
        ),
        compiler_params=pltpu.CompilerParams(
            dimension_semantics=("parallel", "arbitrary")),      # batch tiles parallel (v7x 2 TCs)
    )(frames, params)

    # TODO(synk): consumers that can accept the kernel-native (n_steps, 3, B) layout should skip
    # this transpose (it is an extra HBM pass); kept here to match the torch (B, n_steps, 3) output.
    X = X_t.reshape(Tp, 3, Bp)[:n_steps, :, :B]
    return jnp.transpose(X, (2, 0, 1))                 # (B, n_steps, 3)


# ---------------------------------------------------------------------------
# Plain-JAX reference (mirrors the torch code literally) for validation.
# ---------------------------------------------------------------------------
def _normalise(v):
    return v / jnp.linalg.norm(v, axis=-1, keepdims=True)


def _orthogonalise(source, ref):
    return source - (jnp.sum(source * ref, axis=-1)
                     / jnp.linalg.norm(ref, axis=-1))[:, None] * ref


def reference_simulate(x0, e0, e1, e2, speeds, planar_angles, nonplanar_angles):
    def rotate(v, u, angles):
        cosA = jnp.cos(angles)[:, None]
        sinA = jnp.sin(angles)[:, None]
        udotv = jnp.sum(u * v, axis=-1, keepdims=True)
        return cosA * v + sinA * jnp.cross(u, v) + (1.0 - cosA) * udotv * u

    def step(carry, inp):
        x, e0, e1, e2 = carry
        s, ap, anp = inp
        # planar
        e0 = _normalise(rotate(e0, e2, ap))
        e1 = _normalise(rotate(e1, e2, ap))
        e1 = _normalise(_orthogonalise(e1, e0))
        e2 = _normalise(jnp.cross(e0, e1))
        # nonplanar
        e0 = _normalise(rotate(e0, e1, anp))
        e1 = _normalise(_orthogonalise(e1, e0))
        e2 = _normalise(jnp.cross(e0, e1))
        x = x + s[:, None] * e0
        return (x, e0, e1, e2), x

    inp = (speeds.T, planar_angles.T, nonplanar_angles.T)   # each (n_steps, B)
    _, xs = lax.scan(step, (x0, e0, e1, e2), inp)
    return jnp.transpose(xs, (1, 0, 2))                      # (B, n_steps, 3)


if __name__ == "__main__":
    B = 8
    T, dt = 16.0, 0.25
    n_steps = int(T / dt)                                   # 64 (two 32-step chunks)

    key = jax.random.PRNGKey(0)
    k0, k1, k2, k3, k4 = jax.random.split(key, 5)

    # _init_particle
    x0 = jnp.zeros((B, 3), jnp.float32)
    e0 = _normalise(jax.random.uniform(k0, (B, 3), jnp.float32))
    e1 = _normalise(_orthogonalise(jax.random.uniform(k1, (B, 3), jnp.float32), e0))
    e2 = _normalise(jnp.cross(e0, e1))

    # TODO(synk): _init_state/_update_state/_sample_parameters are abstract (torch Distribution
    # sampling); emulated here by deterministic precomputed per-step schedules.
    speeds = (jnp.exp(0.2 * jax.random.normal(k2, (B, n_steps))) * dt).astype(jnp.float32)
    planar_angles = (0.5 * jax.random.normal(k3, (B, n_steps))).astype(jnp.float32)
    nonplanar_angles = (0.1 * jax.random.normal(k4, (B, n_steps))).astype(jnp.float32)
    states = jnp.zeros((B, n_steps), jnp.float32)           # passthrough (abstract state model)
    ts = jnp.arange(n_steps, dtype=jnp.float32) * dt

    X = simulate(x0, e0, e1, e2, speeds, planar_angles, nonplanar_angles, t_chunk=32)
    X = jax.block_until_ready(X)

    X_ref = reference_simulate(x0, e0, e1, e2, speeds, planar_angles, nonplanar_angles)

    assert X.shape == (B, n_steps, 3)
    assert bool(jnp.allclose(X, X_ref, atol=1e-3, rtol=1e-3)), "Pallas kernel mismatch vs reference"
    print("KERNEL_OK")
</pallas_src>

<mosaic_0001>
module attributes {stable_mosaic.version = 11 : i64} {
  func.func @particle_chunk_kernel(%arg0: i32, %arg1: i32, %arg2: memref<12x1x128xf32, #tpu.memory_space<vmem>>, %arg3: memref<32x3x1x128xf32, #tpu.memory_space<vmem>>, %arg4: memref<32x3x1x128xf32, #tpu.memory_space<vmem>>, %arg5: memref<12x1x128xf32, #tpu.memory_space<vmem>>) attributes {dimension_semantics = [#tpu.dimension_semantics<parallel>, #tpu.dimension_semantics<arbitrary>], iteration_bounds = array<i64: 1, 2>, scalar_prefetch = 0 : i64, scratch_operands = 1 : i64, tpu.core_type = #tpu.core_type<tc>, window_params = [{transform_indices = @transform_0, window_bounds = array<i64: 12, 1, 128>}, {transform_indices = @transform_1, window_bounds = array<i64: 32, 3, 1, 128>}, {transform_indices = @transform_2, window_bounds = array<i64: 32, 3, 1, 128>}]} {
    %c0_i32 = arith.constant 0 : i32
    %0 = arith.cmpi eq, %arg1, %c0_i32 : i32
    %1 = arith.extui %0 : i1 to i32
    %c0_i32_0 = arith.constant 0 : i32
    %2 = arith.cmpi ne, %1, %c0_i32_0 : i32
    scf.if %2 {
      %c0_63 = arith.constant 0 : index
      %c0_64 = arith.constant 0 : index
      %c0_65 = arith.constant 0 : index
      %65 = vector.load %arg2[%c0_63, %c0_64, %c0_65] : memref<12x1x128xf32, #tpu.memory_space<vmem>>, vector<12x1x128xf32>
      %c0_66 = arith.constant 0 : index
      %c0_67 = arith.constant 0 : index
      %c0_68 = arith.constant 0 : index
      %66 = vector.load %arg5[%c0_66, %c0_67, %c0_68] : memref<12x1x128xf32, #tpu.memory_space<vmem>>, vector<12x1x128xf32>
      tpu.vector_store %arg5[%c0_66, %c0_67, %c0_68], %65 {strides = array<i32>} : memref<12x1x128xf32, #tpu.memory_space<vmem>>, vector<12x1x128xf32>,
    } else {
    }
    %c0 = arith.constant 0 : index
    %c0_1 = arith.constant 0 : index
    %c0_2 = arith.constant 0 : index
    %3 = vector.load %arg5[%c0, %c0_1, %c0_2] : memref<12x1x128xf32, #tpu.memory_space<vmem>>, vector<1x1x128xf32>
    %4 = vector.shape_cast %3 : vector<1x1x128xf32> to vector<1x128xf32>
    %c1 = arith.constant 1 : index
    %c0_3 = arith.constant 0 : index
    %c0_4 = arith.constant 0 : index
    %5 = vector.load %arg5[%c1, %c0_3, %c0_4] : memref<12x1x128xf32, #tpu.memory_space<vmem>>, vector<1x1x128xf32>
    %6 = vector.shape_cast %5 : vector<1x1x128xf32> to vector<1x128xf32>
    %c2 = arith.constant 2 : index
    %c0_5 = arith.constant 0 : index
    %c0_6 = arith.constant 0 : index
    %7 = vector.load %arg5[%c2, %c0_5, %c0_6] : memref<12x1x128xf32, #tpu.memory_space<vmem>>, vector<1x1x128xf32>
    %8 = vector.shape_cast %7 : vector<1x1x128xf32> to vector<1x128xf32>
    %c3 = arith.constant 3 : index
    %c0_7 = arith.constant 0 : index
    %c0_8 = arith.constant 0 : index
    %9 = vector.load %arg5[%c3, %c0_7, %c0_8] : memref<12x1x128xf32, #tpu.memory_space<vmem>>, vector<1x1x128xf32>
    %10 = vector.shape_cast %9 : vector<1x1x128xf32> to vector<1x128xf32>
    %c4 = arith.constant 4 : index
    %c0_9 = arith.constant 0 : index
    %c0_10 = arith.constant 0 : index
    %11 = vector.load %arg5[%c4, %c0_9, %c0_10] : memref<12x1x128xf32, #tpu.memory_space<vmem>>, vector<1x1x128xf32>
    %12 = vector.shape_cast %11 : vector<1x1x128xf32> to vector<1x128xf32>
    %c5 = arith.constant 5 : index
    %c0_11 = arith.constant 0 : index
    %c0_12 = arith.constant 0 : index
    %13 = vector.load %arg5[%c5, %c0_11, %c0_12] : memref<12x1x128xf32, #tpu.memory_space<vmem>>, vector<1x1x128xf32>
    %14 = vector.shape_cast %13 : vector<1x1x128xf32> to vector<1x128xf32>
    %c6 = arith.constant 6 : index
    %c0_13 = arith.constant 0 : index
    %c0_14 = arith.constant 0 : index
    %15 = vector.load %arg5[%c6, %c0_13, %c0_14] : memref<12x1x128xf32, #tpu.memory_space<vmem>>, vector<1x1x128xf32>
    %16 = vector.shape_cast %15 : vector<1x1x128xf32> to vector<1x128xf32>
    %c7 = arith.constant 7 : index
    %c0_15 = arith.constant 0 : index
    %c0_16 = arith.constant 0 : index
    %17 = vector.load %arg5[%c7, %c0_15, %c0_16] : memref<12x1x128xf32, #tpu.memory_space<vmem>>, vector<1x1x128xf32>
    %18 = vector.shape_cast %17 : vector<1x1x128xf32> to vector<1x128xf32>
    %c8 = arith.constant 8 : index
    %c0_17 = arith.constant 0 : index
    %c0_18 = arith.constant 0 : index
    %19 = vector.load %arg5[%c8, %c0_17, %c0_18] : memref<12x1x128xf32, #tpu.memory_space<vmem>>, vector<1x1x128xf32>
    %20 = vector.shape_cast %19 : vector<1x1x128xf32> to vector<1x128xf32>
    %c9 = arith.constant 9 : index
    %c0_19 = arith.constant 0 : index
    %c0_20 = arith.constant 0 : index
    %21 = vector.load %arg5[%c9, %c0_19, %c0_20] : memref<12x1x128xf32, #tpu.memory_space<vmem>>, vector<1x1x128xf32>
    %22 = vector.shape_cast %21 : vector<1x1x128xf32> to vector<1x128xf32>
    %c10 = arith.constant 10 : index
    %c0_21 = arith.constant 0 : index
    %c0_22 = arith.constant 0 : index
    %23 = vector.load %arg5[%c10, %c0_21, %c0_22] : memref<12x1x128xf32, #tpu.memory_space<vmem>>, vector<1x1x128xf32>
    %24 = vector.shape_cast %23 : vector<1x1x128xf32> to vector<1x128xf32>
    %c11 = arith.constant 11 : index
    %c0_23 = arith.constant 0 : index
    %c0_24 = arith.constant 0 : index
    %25 = vector.load %arg5[%c11, %c0_23, %c0_24] : memref<12x1x128xf32, #tpu.memory_space<vmem>>, vector<1x1x128xf32>
    %26 = vector.shape_cast %25 : vector<1x1x128xf32> to vector<1x128xf32>
    %c0_i32_25 = arith.constant 0 : i32
    %c32_i32 = arith.constant 32 : i32
    %27 = arith.addi %c0_i32_25, %c32_i32 : i32
    %c1_i32 = arith.constant 1 : i32
    %28:12 = scf.for %arg6 = %c0_i32_25 to %27 step %c1_i32 iter_args(%arg7 = %4, %arg8 = %6, %arg9 = %8, %arg10 = %10, %arg11 = %12, %arg12 = %14, %arg13 = %16, %arg14 = %18, %arg15 = %20, %arg16 = %22, %arg17 = %24, %arg18 = %26) -> (vector<1x128xf32>, vector<1x128xf32>, vector<1x128xf32>, vector<1x128xf32>, vector<1x128xf32>, vector<1x128xf32>, vector<1x128xf32>, vector<1x128xf32>, vector<1x128xf32>, vector<1x128xf32>, vector<1x128xf32>, vector<1x128xf32>)  : i32 {
      %65 = arith.index_cast %arg6 : i32 to index
      %c0_63 = arith.constant 0 : index
      %c0_64 = arith.constant 0 : index
      %c0_65 = arith.constant 0 : index
      %66 = vector.load %arg3[%65, %c0_63, %c0_64, %c0_65] : memref<32x3x1x128xf32, #tpu.memory_space<vmem>>, vector<1x1x1x128xf32>
      %67 = vector.shape_cast %66 : vector<1x1x1x128xf32> to vector<1x128xf32>
      %68 = arith.index_cast %arg6 : i32 to index
      %c1_66 = arith.constant 1 : index
      %c0_67 = arith.constant 0 : index
      %c0_68 = arith.constant 0 : index
      %69 = vector.load %arg3[%68, %c1_66, %c0_67, %c0_68] : memref<32x3x1x128xf32, #tpu.memory_space<vmem>>, vector<1x1x1x128xf32>
      %70 = vector.shape_cast %69 : vector<1x1x1x128xf32> to vector<1x128xf32>
      %71 = arith.index_cast %arg6 : i32 to index
      %c2_69 = arith.constant 2 : index
      %c0_70 = arith.constant 0 : index
      %c0_71 = arith.constant 0 : index
      %72 = vector.load %arg3[%71, %c2_69, %c0_70, %c0_71] : memref<32x3x1x128xf32, #tpu.memory_space<vmem>>, vector<1x1x1x128xf32>
      %73 = vector.shape_cast %72 : vector<1x1x1x128xf32> to vector<1x128xf32>
      %74 = math.cos %70 : vector<1x128xf32>
      %75 = math.sin %70 : vector<1x128xf32>
      %76 = arith.mulf %arg16, %arg10 : vector<1x128xf32>
      %77 = arith.mulf %arg17, %arg11 : vector<1x128xf32>
      %78 = arith.addf %76, %77 : vector<1x128xf32>
      %79 = arith.mulf %arg18, %arg12 : vector<1x128xf32>
      %80 = arith.addf %78, %79 : vector<1x128xf32>
      %81 = arith.mulf %arg17, %arg12 : vector<1x128xf32>
      %82 = arith.mulf %arg18, %arg11 : vector<1x128xf32>
      %83 = arith.subf %81, %82 : vector<1x128xf32>
      %84 = arith.mulf %arg18, %arg10 : vector<1x128xf32>
      %85 = arith.mulf %arg16, %arg12 : vector<1x128xf32>
      %86 = arith.subf %84, %85 : vector<1x128xf32>
      %87 = arith.mulf %arg16, %arg11 : vector<1x128xf32>
      %88 = arith.mulf %arg17, %arg10 : vector<1x128xf32>
      %89 = arith.subf %87, %88 : vector<1x128xf32>
      %cst = arith.constant 1.000000e+00 : f32
      %90 = vector.broadcast %cst : f32 to vector<1x128xf32>
      %91 = arith.subf %90, %74 : vector<1x128xf32>
      %92 = arith.mulf %74, %arg10 : vector<1x128xf32>
      %93 = arith.mulf %75, %83 : vector<1x128xf32>
      %94 = arith.addf %92, %93 : vector<1x128xf32>
      %95 = arith.mulf %91, %80 : vector<1x128xf32>
      %96 = arith.mulf %95, %arg16 : vector<1x128xf32>
      %97 = arith.addf %94, %96 : vector<1x128xf32>
      %98 = arith.mulf %74, %arg11 : vector<1x128xf32>
      %99 = arith.mulf %75, %86 : vector<1x128xf32>
      %100 = arith.addf %98, %99 : vector<1x128xf32>
      %101 = arith.mulf %91, %80 : vector<1x128xf32>
      %102 = arith.mulf %101, %arg17 : vector<1x128xf32>
      %103 = arith.addf %100, %102 : vector<1x128xf32>
      %104 = arith.mulf %74, %arg12 : vector<1x128xf32>
      %105 = arith.mulf %75, %89 : vector<1x128xf32>
      %106 = arith.addf %104, %105 : vector<1x128xf32>
      %107 = arith.mulf %91, %80 : vector<1x128xf32>
      %108 = arith.mulf %107, %arg18 : vector<1x128xf32>
      %109 = arith.addf %106, %108 : vector<1x128xf32>
      %110 = arith.mulf %97, %97 : vector<1x128xf32>
      %111 = arith.mulf %103, %103 : vector<1x128xf32>
      %112 = arith.addf %110, %111 : vector<1x128xf32>
      %113 = arith.mulf %109, %109 : vector<1x128xf32>
      %114 = arith.addf %112, %113 : vector<1x128xf32>
      %115 = math.rsqrt %114 : vector<1x128xf32>
      %116 = arith.mulf %97, %115 : vector<1x128xf32>
      %117 = arith.mulf %103, %115 : vector<1x128xf32>
      %118 = arith.mulf %109, %115 : vector<1x128xf32>
      %119 = arith.mulf %arg16, %arg13 : vector<1x128xf32>
      %120 = arith.mulf %arg17, %arg14 : vector<1x128xf32>
      %121 = arith.addf %119, %120 : vector<1x128xf32>
      %122 = arith.mulf %arg18, %arg15 : vector<1x128xf32>
      %123 = arith.addf %121, %122 : vector<1x128xf32>
      %124 = arith.mulf %arg17, %arg15 : vector<1x128xf32>
      %125 = arith.mulf %arg18, %arg14 : vector<1x128xf32>
      %126 = arith.subf %124, %125 : vector<1x128xf32>
      %127 = arith.mulf %arg18, %arg13 : vector<1x128xf32>
      %128 = arith.mulf %arg16, %arg15 : vector<1x128xf32>
      %129 = arith.subf %127, %128 : vector<1x128xf32>
      %130 = arith.mulf %arg16, %arg14 : vector<1x128xf32>
      %131 = arith.mulf %arg17, %arg13 : vector<1x128xf32>
      %132 = arith.subf %130, %131 : vector<1x128xf32>
      %cst_72 = arith.constant 1.000000e+00 : f32
      %133 = vector.broadcast %cst_72 : f32 to vector<1x128xf32>
      %134 = arith.subf %133, %74 : vector<1x128xf32>
      %135 = arith.mulf %74, %arg13 : vector<1x128xf32>
      %136 = arith.mulf %75, %126 : vector<1x128xf32>
      %137 = arith.addf %135, %136 : vector<1x128xf32>
      %138 = arith.mulf %134, %123 : vector<1x128xf32>
      %139 = arith.mulf %138, %arg16 : vector<1x128xf32>
      %140 = arith.addf %137, %139 : vector<1x128xf32>
      %141 = arith.mulf %74, %arg14 : vector<1x128xf32>
      %142 = arith.mulf %75, %129 : vector<1x128xf32>
      %143 = arith.addf %141, %142 : vector<1x128xf32>
      %144 = arith.mulf %134, %123 : vector<1x128xf32>
      %145 = arith.mulf %144, %arg17 : vector<1x128xf32>
      %146 = arith.addf %143, %145 : vector<1x128xf32>
      %147 = arith.mulf %74, %arg15 : vector<1x128xf32>
      %148 = arith.mulf %75, %132 : vector<1x128xf32>
      %149 = arith.addf %147, %148 : vector<1x128xf32>
      %150 = arith.mulf %134, %123 : vector<1x128xf32>
      %151 = arith.mulf %150, %arg18 : vector<1x128xf32>
      %152 = arith.addf %149, %151 : vector<1x128xf32>
      %153 = arith.mulf %140, %140 : vector<1x128xf32>
      %154 = arith.mulf %146, %146 : vector<1x128xf32>
      %155 = arith.addf %153, %154 : vector<1x128xf32>
      %156 = arith.mulf %152, %152 : vector<1x128xf32>
      %157 = arith.addf %155, %156 : vector<1x128xf32>
      %158 = math.rsqrt %157 : vector<1x128xf32>
      %159 = arith.mulf %140, %158 : vector<1x128xf32>
      %160 = arith.mulf %146, %158 : vector<1x128xf32>
      %161 = arith.mulf %152, %158 : vector<1x128xf32>
      %162 = arith.mulf %159, %116 : vector<1x128xf32>
      %163 = arith.mulf %160, %117 : vector<1x128xf32>
      %164 = arith.addf %162, %163 : vector<1x128xf32>
      %165 = arith.mulf %161, %118 : vector<1x128xf32>
      %166 = arith.addf %164, %165 : vector<1x128xf32>
      %167 = arith.mulf %116, %116 : vector<1x128xf32>
      %168 = arith.mulf %117, %117 : vector<1x128xf32>
      %169 = arith.addf %167, %168 : vector<1x128xf32>
      %170 = arith.mulf %118, %118 : vector<1x128xf32>
      %171 = arith.addf %169, %170 : vector<1x128xf32>
      %172 = math.rsqrt %171 : vector<1x128xf32>
      %173 = arith.mulf %166, %172 : vector<1x128xf32>
      %174 = arith.mulf %173, %116 : vector<1x128xf32>
      %175 = arith.subf %159, %174 : vector<1x128xf32>
      %176 = arith.mulf %173, %117 : vector<1x128xf32>
      %177 = arith.subf %160, %176 : vector<1x128xf32>
      %178 = arith.mulf %173, %118 : vector<1x128xf32>
      %179 = arith.subf %161, %178 : vector<1x128xf32>
      %180 = arith.mulf %175, %175 : vector<1x128xf32>
      %181 = arith.mulf %177, %177 : vector<1x128xf32>
      %182 = arith.addf %180, %181 : vector<1x128xf32>
      %183 = arith.mulf %179, %179 : vector<1x128xf32>
      %184 = arith.addf %182, %183 : vector<1x128xf32>
      %185 = math.rsqrt %184 : vector<1x128xf32>
      %186 = arith.mulf %175, %185 : vector<1x128xf32>
      %187 = arith.mulf %177, %185 : vector<1x128xf32>
      %188 = arith.mulf %179, %185 : vector<1x128xf32>
      %189 = math.cos %73 : vector<1x128xf32>
      %190 = math.sin %73 : vector<1x128xf32>
      %191 = arith.mulf %186, %116 : vector<1x128xf32>
      %192 = arith.mulf %187, %117 : vector<1x128xf32>
      %193 = arith.addf %191, %192 : vector<1x128xf32>
      %194 = arith.mulf %188, %118 : vector<1x128xf32>
      %195 = arith.addf %193, %194 : vector<1x128xf32>
      %196 = arith.mulf %187, %118 : vector<1x128xf32>
      %197 = arith.mulf %188, %117 : vector<1x128xf32>
      %198 = arith.subf %196, %197 : vector<1x128xf32>
      %199 = arith.mulf %188, %116 : vector<1x128xf32>
      %200 = arith.mulf %186, %118 : vector<1x128xf32>
      %201 = arith.subf %199, %200 : vector<1x128xf32>
      %202 = arith.mulf %186, %117 : vector<1x128xf32>
      %203 = arith.mulf %187, %116 : vector<1x128xf32>
      %204 = arith.subf %202, %203 : vector<1x128xf32>
      %cst_73 = arith.constant 1.000000e+00 : f32
      %205 = vector.broadcast %cst_73 : f32 to vector<1x128xf32>
      %206 = arith.subf %205, %189 : vector<1x128xf32>
      %207 = arith.mulf %189, %116 : vector<1x128xf32>
      %208 = arith.mulf %190, %198 : vector<1x128xf32>
      %209 = arith.addf %207, %208 : vector<1x128xf32>
      %210 = arith.mulf %206, %195 : vector<1x128xf32>
      %211 = arith.mulf %210, %186 : vector<1x128xf32>
      %212 = arith.addf %209, %211 : vector<1x128xf32>
      %213 = arith.mulf %189, %117 : vector<1x128xf32>
      %214 = arith.mulf %190, %201 : vector<1x128xf32>
      %215 = arith.addf %213, %214 : vector<1x128xf32>
      %216 = arith.mulf %206, %195 : vector<1x128xf32>
      %217 = arith.mulf %216, %187 : vector<1x128xf32>
      %218 = arith.addf %215, %217 : vector<1x128xf32>
      %219 = arith.mulf %189, %118 : vector<1x128xf32>
      %220 = arith.mulf %190, %204 : vector<1x128xf32>
      %221 = arith.addf %219, %220 : vector<1x128xf32>
      %222 = arith.mulf %206, %195 : vector<1x128xf32>
      %223 = arith.mulf %222, %188 : vector<1x128xf32>
      %224 = arith.addf %221, %223 : vector<1x128xf32>
      %225 = arith.mulf %212, %212 : vector<1x128xf32>
      %226 = arith.mulf %218, %218 : vector<1x128xf32>
      %227 = arith.addf %225, %226 : vector<1x128xf32>
      %228 = arith.mulf %224, %224 : vector<1x128xf32>
      %229 = arith.addf %227, %228 : vector<1x128xf32>
      %230 = math.rsqrt %229 : vector<1x128xf32>
      %231 = arith.mulf %212, %230 : vector<1x128xf32>
      %232 = arith.mulf %218, %230 : vector<1x128xf32>
      %233 = arith.mulf %224, %230 : vector<1x128xf32>
      %234 = arith.mulf %186, %231 : vector<1x128xf32>
      %235 = arith.mulf %187, %232 : vector<1x128xf32>
      %236 = arith.addf %234, %235 : vector<1x128xf32>
      %237 = arith.mulf %188, %233 : vector<1x128xf32>
      %238 = arith.addf %236, %237 : vector<1x128xf32>
      %239 = arith.mulf %231, %231 : vector<1x128xf32>
      %240 = arith.mulf %232, %232 : vector<1x128xf32>
      %241 = arith.addf %239, %240 : vector<1x128xf32>
      %242 = arith.mulf %233, %233 : vector<1x128xf32>
      %243 = arith.addf %241, %242 : vector<1x128xf32>
      %244 = math.rsqrt %243 : vector<1x128xf32>
      %245 = arith.mulf %238, %244 : vector<1x128xf32>
      %246 = arith.mulf %245, %231 : vector<1x128xf32>
      %247 = arith.subf %186, %246 : vector<1x128xf32>
      %248 = arith.mulf %245, %232 : vector<1x128xf32>
      %249 = arith.subf %187, %248 : vector<1x128xf32>
      %250 = arith.mulf %245, %233 : vector<1x128xf32>
      %251 = arith.subf %188, %250 : vector<1x128xf32>
      %252 = arith.mulf %247, %247 : vector<1x128xf32>
      %253 = arith.mulf %249, %249 : vector<1x128xf32>
      %254 = arith.addf %252, %253 : vector<1x128xf32>
      %255 = arith.mulf %251, %251 : vector<1x128xf32>
      %256 = arith.addf %254, %255 : vector<1x128xf32>
      %257 = math.rsqrt %256 : vector<1x128xf32>
      %258 = arith.mulf %247, %257 : vector<1x128xf32>
      %259 = arith.mulf %249, %257 : vector<1x128xf32>
      %260 = arith.mulf %251, %257 : vector<1x128xf32>
      %261 = arith.mulf %232, %260 : vector<1x128xf32>
      %262 = arith.mulf %233, %259 : vector<1x128xf32>
      %263 = arith.subf %261, %262 : vector<1x128xf32>
      %264 = arith.mulf %233, %258 : vector<1x128xf32>
      %265 = arith.mulf %231, %260 : vector<1x128xf32>
      %266 = arith.subf %264, %265 : vector<1x128xf32>
      %267 = arith.mulf %231, %259 : vector<1x128xf32>
      %268 = arith.mulf %232, %258 : vector<1x128xf32>
      %269 = arith.subf %267, %268 : vector<1x128xf32>
      %270 = arith.mulf %263, %263 : vector<1x128xf32>
      %271 = arith.mulf %266, %266 : vector<1x128xf32>
      %272 = arith.addf %270, %271 : vector<1x128xf32>
      %273 = arith.mulf %269, %269 : vector<1x128xf32>
      %274 = arith.addf %272, %273 : vector<1x128xf32>
      %275 = math.rsqrt %274 : vector<1x128xf32>
      %276 = arith.mulf %263, %275 : vector<1x128xf32>
      %277 = arith.mulf %266, %275 : vector<1x128xf32>
      %278 = arith.mulf %269, %275 : vector<1x128xf32>
      %279 = arith.mulf %67, %231 : vector<1x128xf32>
      %280 = arith.addf %arg7, %279 : vector<1x128xf32>
      %281 = arith.mulf %67, %232 : vector<1x128xf32>
      %282 = arith.addf %arg8, %281 : vector<1x128xf32>
      %283 = arith.mulf %67, %233 : vector<1x128xf32>
      %284 = arith.addf %arg9, %283 : vector<1x128xf32>
      %285 = arith.index_cast %arg6 : i32 to index
      %c0_74 = arith.constant 0 : index
      %c0_75 = arith.constant 0 : index
      %c0_76 = arith.constant 0 : index
      %286 = vector.load %arg4[%285, %c0_74, %c0_75, %c0_76] : memref<32x3x1x128xf32, #tpu.memory_space<vmem>>, vector<1x1x1x128xf32>
      %287 = vector.shape_cast %286 : vector<1x1x1x128xf32> to vector<1x128xf32>
      %288 = vector.shape_cast %280 : vector<1x128xf32> to vector<1x1x1x128xf32>
      tpu.vector_store %arg4[%285, %c0_74, %c0_75, %c0_76], %288 {strides = array<i32>} : memref<32x3x1x128xf32, #tpu.memory_space<vmem>>, vector<1x1x1x128xf32>,
      %289 = arith.index_cast %arg6 : i32 to index
      %c1_77 = arith.constant 1 : index
      %c0_78 = arith.constant 0 : index
      %c0_79 = arith.constant 0 : index
      %290 = vector.load %arg4[%289, %c1_77, %c0_78, %c0_79] : memref<32x3x1x128xf32, #tpu.memory_space<vmem>>, vector<1x1x1x128xf32>
      %291 = vector.shape_cast %290 : vector<1x1x1x128xf32> to vector<1x128xf32>
      %292 = vector.shape_cast %282 : vector<1x128xf32> to vector<1x1x1x128xf32>
      tpu.vector_store %arg4[%289, %c1_77, %c0_78, %c0_79], %292 {strides = array<i32>} : memref<32x3x1x128xf32, #tpu.memory_space<vmem>>, vector<1x1x1x128xf32>,
      %293 = arith.index_cast %arg6 : i32 to index
      %c2_80 = arith.constant 2 : index
      %c0_81 = arith.constant 0 : index
      %c0_82 = arith.constant 0 : index
      %294 = vector.load %arg4[%293, %c2_80, %c0_81, %c0_82] : memref<32x3x1x128xf32, #tpu.memory_space<vmem>>, vector<1x1x1x128xf32>
      %295 = vector.shape_cast %294 : vector<1x1x1x128xf32> to vector<1x128xf32>
      %296 = vector.shape_cast %284 : vector<1x128xf32> to vector<1x1x1x128xf32>
      tpu.vector_store %arg4[%293, %c2_80, %c0_81, %c0_82], %296 {strides = array<i32>} : memref<32x3x1x128xf32, #tpu.memory_space<vmem>>, vector<1x1x1x128xf32>,
      scf.yield %280, %282, %284, %231, %232, %233, %258, %259, %260, %276, %277, %278 : vector<1x128xf32>, vector<1x128xf32>, vector<1x128xf32>, vector<1x128xf32>, vector<1x128xf32>, vector<1x128xf32>, vector<1x128xf32>, vector<1x128xf32>, vector<1x128xf32>, vector<1x128xf32>, vector<1x128xf32>, vector<1x128xf32>
    }
    %c32_i32_26 = arith.constant 32 : i32
    %c0_27 = arith.constant 0 : index
    %c0_28 = arith.constant 0 : index
    %c0_29 = arith.constant 0 : index
    %29 = vector.load %arg5[%c0_27, %c0_28, %c0_29] : memref<12x1x128xf32, #tpu.memory_space<vmem>>, vector<1x1x128xf32>
    %30 = vector.shape_cast %29 : vector<1x1x128xf32> to vector<1x128xf32>
    %31 = vector.shape_cast %28#0 : vector<1x128xf32> to vector<1x1x128xf32>
    tpu.vector_store %arg5[%c0_27, %c0_28, %c0_29], %31 {strides = array<i32>} : memref<12x1x128xf32, #tpu.memory_space<vmem>>, vector<1x1x128xf32>,
    %c1_30 = arith.constant 1 : index
    %c0_31 = arith.constant 0 : index
    %c0_32 = arith.constant 0 : index
    %32 = vector.load %arg5[%c1_30, %c0_31, %c0_32] : memref<12x1x128xf32, #tpu.memory_space<vmem>>, vector<1x1x128xf32>
    %33 = vector.shape_cast %32 : vector<1x1x128xf32> to vector<1x128xf32>
    %34 = vector.shape_cast %28#1 : vector<1x128xf32> to vector<1x1x128xf32>
    tpu.vector_store %arg5[%c1_30, %c0_31, %c0_32], %34 {strides = array<i32>} : memref<12x1x128xf32, #tpu.memory_space<vmem>>, vector<1x1x128xf32>,
    %c2_33 = arith.constant 2 : index
    %c0_34 = arith.constant 0 : index
    %c0_35 = arith.constant 0 : index
    %35 = vector.load %arg5[%c2_33, %c0_34, %c0_35] : memref<12x1x128xf32, #tpu.memory_space<vmem>>, vector<1x1x128xf32>
    %36 = vector.shape_cast %35 : vector<1x1x128xf32> to vector<1x128xf32>
    %37 = vector.shape_cast %28#2 : vector<1x128xf32> to vector<1x1x128xf32>
    tpu.vector_store %arg5[%c2_33, %c0_34, %c0_35], %37 {strides = array<i32>} : memref<12x1x128xf32, #tpu.memory_space<vmem>>, vector<1x1x128xf32>,
    %c3_36 = arith.constant 3 : index
    %c0_37 = arith.constant 0 : index
    %c0_38 = arith.constant 0 : index
    %38 = vector.load %arg5[%c3_36, %c0_37, %c0_38] : memref<12x1x128xf32, #tpu.memory_space<vmem>>, vector<1x1x128xf32>
    %39 = vector.shape_cast %38 : vector<1x1x128xf32> to vector<1x128xf32>
    %40 = vector.shape_cast %28#3 : vector<1x128xf32> to vector<1x1x128xf32>
    tpu.vector_store %arg5[%c3_36, %c0_37, %c0_38], %40 {strides = array<i32>} : memref<12x1x128xf32, #tpu.memory_space<vmem>>, vector<1x1x128xf32>,
    %c4_39 = arith.constant 4 : index
    %c0_40 = arith.constant 0 : index
    %c0_41 = arith.constant 0 : index
    %41 = vector.load %arg5[%c4_39, %c0_40, %c0_41] : memref<12x1x128xf32, #tpu.memory_space<vmem>>, vector<1x1x128xf32>
    %42 = vector.shape_cast %41 : vector<1x1x128xf32> to vector<1x128xf32>
    %43 = vector.shape_cast %28#4 : vector<1x128xf32> to vector<1x1x128xf32>
    tpu.vector_store %arg5[%c4_39, %c0_40, %c0_41], %43 {strides = array<i32>} : memref<12x1x128xf32, #tpu.memory_space<vmem>>, vector<1x1x128xf32>,
    %c5_42 = arith.constant 5 : index
    %c0_43 = arith.constant 0 : index
    %c0_44 = arith.constant 0 : index
    %44 = vector.load %arg5[%c5_42, %c0_43, %c0_44] : memref<12x1x128xf32, #tpu.memory_space<vmem>>, vector<1x1x128xf32>
    %45 = vector.shape_cast %44 : vector<1x1x128xf32> to vector<1x128xf32>
    %46 = vector.shape_cast %28#5 : vector<1x128xf32> to vector<1x1x128xf32>
    tpu.vector_store %arg5[%c5_42, %c0_43, %c0_44], %46 {strides = array<i32>} : memref<12x1x128xf32, #tpu.memory_space<vmem>>, vector<1x1x128xf32>,
    %c6_45 = arith.constant 6 : index
    %c0_46 = arith.constant 0 : index
    %c0_47 = arith.constant 0 : index
    %47 = vector.load %arg5[%c6_45, %c0_46, %c0_47] : memref<12x1x128xf32, #tpu.memory_space<vmem>>, vector<1x1x128xf32>
    %48 = vector.shape_cast %47 : vector<1x1x128xf32> to vector<1x128xf32>
    %49 = vector.shape_cast %28#6 : vector<1x128xf32> to vector<1x1x128xf32>
    tpu.vector_store %arg5[%c6_45, %c0_46, %c0_47], %49 {strides = array<i32>} : memref<12x1x128xf32, #tpu.memory_space<vmem>>, vector<1x1x128xf32>,
    %c7_48 = arith.constant 7 : index
    %c0_49 = arith.constant 0 : index
    %c0_50 = arith.constant 0 : index
    %50 = vector.load %arg5[%c7_48, %c0_49, %c0_50] : memref<12x1x128xf32, #tpu.memory_space<vmem>>, vector<1x1x128xf32>
    %51 = vector.shape_cast %50 : vector<1x1x128xf32> to vector<1x128xf32>
    %52 = vector.shape_cast %28#7 : vector<1x128xf32> to vector<1x1x128xf32>
    tpu.vector_store %arg5[%c7_48, %c0_49, %c0_50], %52 {strides = array<i32>} : memref<12x1x128xf32, #tpu.memory_space<vmem>>, vector<1x1x128xf32>,
    %c8_51 = arith.constant 8 : index
    %c0_52 = arith.constant 0 : index
    %c0_53 = arith.constant 0 : index
    %53 = vector.load %arg5[%c8_51, %c0_52, %c0_53] : memref<12x1x128xf32, #tpu.memory_space<vmem>>, vector<1x1x128xf32>
    %54 = vector.shape_cast %53 : vector<1x1x128xf32> to vector<1x128xf32>
    %55 = vector.shape_cast %28#8 : vector<1x128xf32> to vector<1x1x128xf32>
    tpu.vector_store %arg5[%c8_51, %c0_52, %c0_53], %55 {strides = array<i32>} : memref<12x1x128xf32, #tpu.memory_space<vmem>>, vector<1x1x128xf32>,
    %c9_54 = arith.constant 9 : index
    %c0_55 = arith.constant 0 : index
    %c0_56 = arith.constant 0 : index
    %56 = vector.load %arg5[%c9_54, %c0_55, %c0_56] : memref<12x1x128xf32, #tpu.memory_space<vmem>>, vector<1x1x128xf32>
    %57 = vector.shape_cast %56 : vector<1x1x128xf32> to vector<1x128xf32>
    %58 = vector.shape_cast %28#9 : vector<1x128xf32> to vector<1x1x128xf32>
    tpu.vector_store %arg5[%c9_54, %c0_55, %c0_56], %58 {strides = array<i32>} : memref<12x1x128xf32, #tpu.memory_space<vmem>>, vector<1x1x128xf32>,
    %c10_57 = arith.constant 10 : index
    %c0_58 = arith.constant 0 : index
    %c0_59 = arith.constant 0 : index
    %59 = vector.load %arg5[%c10_57, %c0_58, %c0_59] : memref<12x1x128xf32, #tpu.memory_space<vmem>>, vector<1x1x128xf32>
    %60 = vector.shape_cast %59 : vector<1x1x128xf32> to vector<1x128xf32>
    %61 = vector.shape_cast %28#10 : vector<1x128xf32> to vector<1x1x128xf32>
    tpu.vector_store %arg5[%c10_57, %c0_58, %c0_59], %61 {strides = array<i32>} : memref<12x1x128xf32, #tpu.memory_space<vmem>>, vector<1x1x128xf32>,
    %c11_60 = arith.constant 11 : index
    %c0_61 = arith.constant 0 : index
    %c0_62 = arith.constant 0 : index
    %62 = vector.load %arg5[%c11_60, %c0_61, %c0_62] : memref<12x1x128xf32, #tpu.memory_space<vmem>>, vector<1x1x128xf32>
    %63 = vector.shape_cast %62 : vector<1x1x128xf32> to vector<1x128xf32>
    %64 = vector.shape_cast %28#11 : vector<1x128xf32> to vector<1x1x128xf32>
    tpu.vector_store %arg5[%c11_60, %c0_61, %c0_62], %64 {strides = array<i32>} : memref<12x1x128xf32, #tpu.memory_space<vmem>>, vector<1x1x128xf32>,
    return
  }
  func.func @transform_0(%arg0: i32, %arg1: i32) -> (i32, i32, i32) {
    %c0_i32 = arith.constant 0 : i32
    %c0_i32_0 = arith.constant 0 : i32
    %c0_i32_1 = arith.constant 0 : i32
    return %c0_i32, %arg0, %c0_i32_0 : i32, i32, i32
  }
  func.func @transform_1(%arg0: i32, %arg1: i32) -> (i32, i32, i32, i32) {
    %c0_i32 = arith.constant 0 : i32
    %c0_i32_0 = arith.constant 0 : i32
    %c0_i32_1 = arith.constant 0 : i32
    return %arg1, %c0_i32, %arg0, %c0_i32_0 : i32, i32, i32, i32
  }
  func.func @transform_2(%arg0: i32, %arg1: i32) -> (i32, i32, i32, i32) {
    %c0_i32 = arith.constant 0 : i32
    %c0_i32_0 = arith.constant 0 : i32
    %c0_i32_1 = arith.constant 0 : i32
    return %arg1, %c0_i32, %arg0, %c0_i32_0 : i32, i32, i32, i32
  }
}

</mosaic_0001>

<bundles_post_ra>
// kernel: tpu_custom_call.1
= control target key start
LH: loop header
LB: loop body
LE: loop exit
PB: predicated region body
PF: predicated region fallthrough
CT: control target
= control target key end

     0   :  { %7 = vsyncpa [#allocation4], 0  ;;  %s2141_s0 = inlined_call_operand.hbm [shape: f32[12,1,128], index: 0, kind: input, shape index: {}]   ;;  %s2142_s1 = inlined_call_operand.hbm [shape: f32[64,3,1,128], index: 1, kind: input, shape index: {}]   ;;  %s2143_s2 = inlined_call_operand.hbm [shape: f32[64,3,1,128], index: 2, kind: output, shape index: {}]  }
   0x1   :  { %8 = vsyncpa [#allocation7], 0 }
   0x2   :  { %10 = vsyncpa [#allocation7 + $0x1], 0 }
   0x3   :  { %11 = vsyncpa [#allocation5], 0 }
   0x4   :  { %13 = vsyncpa [#allocation5 + $0x1], 0  ;;  %s1614_s9 = smov 0   ;;  %s1616_s10 = smov 0  }
   0x5   :  { %s1618_s11 = smov 0   ;;  %s1620_s12 = smov 0  }
   0x6   :  { %s1622_s13 = smov 0   ;;  %s1624_s14 = smov 0  }
   0x7 LB: > { %s1083_s15 = sadd.s32 4294967295, %s1532_s14   ;;  %s1084_s16 = sadd.s32 4294967294, %s1532_s14   ;;  %s1532_s14 = sphi %s1624_s14, %s19_s14   ;;  %s1528_s13 = sphi %s1622_s13, %s2177_s13   ;;  %s1524_s12 = sphi %s1620_s12, %s2176_s12   ;;  %s1520_s11 = sphi %s1618_s11, %s2175_s11   ;;  %s1516_s10 = sphi %s1616_s10, %s2174_s10   ;;  %s1512_s9 = sphi %s1614_s9, %s2173_s9  }
   0x8   : > { %p79_p0 = scmp.ne.s32.totalorder %s1516_s10, %s1512_s9  ;;  %p1648_p1 = scmp.eq.s32.totalorder %s1083_s15, 0 }
   0x9   : > { %p1652_p2 = scmp.eq.s32.totalorder %s1083_s15, 1  ;;  %p111_p3 = scmp.eq.s32.totalorder %s1084_s16, 1 }
   0xa   : > { %p1658_p4 = por %p1648_p1, %p79_p0  ;;  %p1085_p5 = scmp.ge.s32.totalorder %s1532_s14, 1 }
   0xb   : > { %p1663_p6 = por %p111_p3, %p79_p0  ;;  %p118_p7 = scmp.lt.s32.totalorder %s1532_s14, 3 }
   0xc   : > { %s2147_s19 = scalar_select %p1658_p4, 1, 0 }
   0xd   : > { %s2148_s20 = scalar_select %p1663_p6, 1, 0 }
   0xe   : > { %p1668_p8 = pnand %p1085_p5, %p118_p7  ;;  %s1586_s22 = smov [#allocation3]  }
   0xf   : > { %s132_s23 = sshll.u32 %s1586_s22, 4  ;;  %p1087_p10 = scmp.ge.s32.totalorder %s1532_s14, 2  ;;  %s133_s23 = int_to_ptr.vmem [resolvable:$true] %s132_s23 }
  0x10   : > { %p1139_p9 = pneg %p1668_p8  ;;  %s28_s25 = sadd.s32 1, %s1528_s13 }
  0x11   : > { %s1353_s26 = scalar_lea.vmem %s133_s23, 192  ;;  %p1361_p5 = scmp.lt.s32.totalorder %s133_s23, %s133_s23 }
  0x12   : > { %p1677_p11 = pnand %p1139_p9, %p1648_p1  ;;  %p1354_p13 = scmp.ne.s32.totalorder %s133_s23, %s1353_s26 }
  0x13   : > { %p1362_p7 = scmp.lt.s32.totalorder %s1353_s26, %s1353_s26 }
  0x14   : > { %p1344_p12 = pneg %p1677_p11 }
  0x15   : > { %p1363_p6 = por %p1362_p7, %p1361_p5 }
  0x16   : > { %p1356_p0 = pnand %p1354_p13, %p1344_p12 }
  0x18   : > { %p1357_p3 = pneg %p1356_p0 }
  0x1a   : > { %p1364_p4 = pnand %p1363_p6, %p1357_p3 }
  0x1c   : > { %1367 = shalt.err (!%p1364_p4)
}
  0x1d   : > { %s1587_s27 = smov 16   ;;  %s1588_s28 = smov 1  }
  0x1e   : > { %1142 = dma.hbm_to_vmem [thread:$0]  (!%p1677_p11), %s2141_s0, 192, %s133_s23, [#allocation4], %s1587_s27, %s1587_s27, %s1588_s28  }
  0x1f   : > { %p29_p4 = scmp.ge.s32.totalorder %s28_s25, 2  ;;  %s66_s3 = sadd.s32 1, %s1520_s11 }
  0x20   : > { %p73_p6 = scmp.ne.s32.totalorder %s1520_s11, %s1516_s10  ;;  %p74_p9 = scmp.eq.s32.totalorder %s1532_s14, 0 }
  0x21   : > { %s2179_s25 = smov (%p29_p4, %s28_s25), 0  ;;  %p1152_p0 = scmp.lt.s32.totalorder %s1532_s14, 2 }
  0x22   : > { %p75_p12 = por %p74_p9, %p73_p6  ;;  %p1700_p13 = por %p1652_p2, %p73_p6 }
  0x23   : > { %s61_s5 = ssub.s32 %s1528_s13, %s2179_s25  ;;  %s146_s6 = sand.u32 1, %s1520_s11  }
  0x24   : > { %p64_p3 = scmp.eq.s32.totalorder %s61_s5, 0  ;;  %s1119_s7 = smul.u32 96, %s146_s6 }
  0x25   : > { %s1120_s15 = smul.u32 1536, %s1528_s13  ;;  %p1712_p11 = pnand %p1152_p0, %p75_p12 }
  0x26   : > { %s1709_s8 = scalar_select %p64_p3, %s1520_s11, %s66_s3  }
  0x27   : > { %s150_s16 = scalar_lea.vmem [#allocation6], %s1119_s7  ;;  %s158_s26 = scalar_lea.hbm %s2142_s1, %s1120_s15 }
  0x28   : > { %s159_s22 = sshll.u32 %s150_s16, 4  ;;  %s147_s29 = scalar_lea.sflag [#allocation7], %s146_s6  ;;  %s160_s22 = int_to_ptr.vmem [resolvable:$true] %s159_s22 }
  0x29   : > { %p1370_p2 = pneg %p1712_p11  ;;  %s1381_s30 = scalar_lea.vmem %s160_s22, 1536 }
  0x2a   : > { %p1382_p5 = scmp.ne.s32.totalorder %s160_s22, %s1381_s30  ;;  %s1589_s3 = smov [#allocation6]  }
  0x2b   : > { %s1386_s5 = sshll.u32 %s1589_s3, 4  ;;  %s1387_s5 = int_to_ptr.vmem [resolvable:$false] %s1386_s5 }
  0x2c   : > { %p1384_p7 = pnand %p1382_p5, %p1370_p2  ;;  %s1388_s7 = scalar_lea.vmem %s1387_s5, 3072 }
  0x2d   : > { %p1389_p6 = scmp.lt.s32.totalorder %s160_s22, %s1387_s5  ;;  %p1390_p9 = scmp.lt.s32.totalorder %s1388_s7, %s1381_s30 }
  0x2e   : > { %p1385_p4 = pneg %p1384_p7 }
  0x2f   : > { %p1391_p12 = por %p1390_p9, %p1389_p6 }
  0x31   : > { %p1392_p0 = pnand %p1391_p12, %p1385_p4 }
  0x33   : > { %1395 = shalt.err (!%p1392_p0)
}
  0x34   : > { %1146 = dma.hbm_to_vmem [thread:$0]  (!%p1712_p11), %s158_s26, 1536, %s160_s22, %s147_s29, %s1587_s27, %s1587_s27, %s1588_s28  }
  0x35   : > { %171 = sbr.rel (%p1668_p8) target bundleno = 373 (0x175), region = 28 }
  0x3a   : > { %1499 = dma.done.wait (%p1648_p1), [#allocation4], 192  }
  0x3b   : > { %1501 = vsyncadd (%p1648_p1), [#allocation4], 4294967104  ;;  %s1733_s6 = sand.u32 1, %s1516_s10   ;;  %p2153_p3 = scmp.ne.s32.totalorder %s2147_s19, 0 }
  0x3c   : > { %s1121_s15 = smul.u32 96, %s1733_s6  ;;  %s178_s16 = scalar_lea.sflag [#allocation7], %s1733_s6 }
  0x3e   : > { %s1737_s23 = scalar_lea.vmem [#allocation6], %s1121_s15 }
  0x3f   : > { %1503 = dma.done.wait (%p2153_p3), %s178_s16, 1536  }
  0x40   : > { %1505 = vsyncadd (%p2153_p3), %s178_s16, 4294965760  ;;  %s1743_s21 = scalar_lea.vmem [#allocation8], %s1121_s15  ;;  %p1093_p8 = scmp.ne.s32.totalorder %s1524_s12, 0 }
  0x42   : > { %207 = sbr.rel (%p1093_p8) target bundleno = 73 (0x49), region = 40 }
  0x47   : > { %v208_v0 = vld [vmem:[#allocation3] sm:$0xff]   ;;  %v216_v1 = vld [vmem:[#allocation3 + $0x8] sm:$0xf]  }
  0x48   : > { %220 = vst [vmem:[#allocation2] sm:$0xff] %v208_v0   ;;  %228 = vst [vmem:[#allocation2 + $0x8] sm:$0xf] %v216_v1  }
  0x49 PF: > { %s1770_s17 = smov 0  }
  0x4f   : > { %v232_v2 = vld [vmem:[#allocation2] sm:$0x1]   ;;  %v234_v3 = vld [vmem:[#allocation2 + $0x1] sm:$0x1]   ;;  %v236_v4 = vld [vmem:[#allocation2 + $0x2] sm:$0x1]  }
  0x50   : > { %v238_v5 = vld [vmem:[#allocation2 + $0x3] sm:$0x1]   ;;  %v240_v6 = vld [vmem:[#allocation2 + $0x4] sm:$0x1]   ;;  %v242_v7 = vld [vmem:[#allocation2 + $0x5] sm:$0x1]  }
  0x51   : > { %v244_v8 = vld [vmem:[#allocation2 + $0x6] sm:$0x1]   ;;  %v246_v9 = vld [vmem:[#allocation2 + $0x7] sm:$0x1]   ;;  %v248_v10 = vld [vmem:[#allocation2 + $0x8] sm:$0x1]  }
  0x52   : > { %v250_v11 = vld [vmem:[#allocation2 + $0x9] sm:$0x1]   ;;  %v252_v12 = vld [vmem:[#allocation2 + $0xa] sm:$0x1]   ;;  %v254_v13 = vld [vmem:[#allocation2 + $0xb] sm:$0x1]  }
  0x53 LB: >> { %s273_s19 = smul.u32 3, %s1584_s17  ;;  %v1590_v26 = vmov 683565275   ;;  %v1591_v28 = vmov 2475754826   ;;  %s260_s17 = sadd.s32 1, %s1584_s17   ;;  %s1584_s17 = sphi %s1770_s17, %s260_s17   ;;  %v1580_v2 = vphi %v232_v2, %v2171_v2   ;;  %v1576_v3 = vphi %v234_v3, %v2170_v3   ;;  %v1572_v4 = vphi %v236_v4, %v2169_v4   ;;  %v1568_v5 = vphi %v238_v5, %v2168_v5   ;;  %v1564_v6 = vphi %v240_v6, %v2167_v6   ;;  %v1560_v7 = vphi %v242_v7, %v2166_v7   ;;  %v1556_v8 = vphi %v244_v8, %v2165_v8   ;;  %v1552_v9 = vphi %v246_v9, %v2164_v9   ;;  %v1548_v10 = vphi %v248_v10, %v2163_v10   ;;  %v1544_v11 = vphi %v250_v11, %v2162_v11   ;;  %v1540_v12 = vphi %v252_v12, %v2161_v12   ;;  %v1536_v13 = vphi %v254_v13, %v2160_v13  }
  0x54   : >> { %v1592_v30 = vmov 2131351028   ;;  %v1593_v32 = vmov 2102212464   ;;  %v1594_v34 = vmov 920167782  }
  0x55   : >> { %s1815_s27 = scalar_lea.vmem %s1737_s23, %s273_s19 [#allocation6]  ;;  %v1595_v43 = vmov 1326507024   ;;  %s893_s28 = scalar_lea.vmem %s1743_s21, %s273_s19 [#allocation8] }
  0x56   : >> { %v1818_v14 = vld [vmem:[%s1815_s27 + $0x1] sm:$0x1]  ;;  %v1830_v37 = vld [vmem:[%s1815_s27 + $0x2] sm:$0x1]  ;;  %p2048_p1 = scmp.ge.s32.totalorder %s260_s17, 32  }
  0x57   : >> { %v285_v15 = vand.u32 2139095040, %v1818_v14  ;;  %v282_v16 = vand.u32 2147483647, %v1818_v14  ;;  %v598_v50 = vand.u32 2139095040, %v1830_v37  ;;  %vm284_vm13 = vcmp.lt.s32.totalorder %v1818_v14, 0  ;;  %s1130_s24 = smul.u32 (%p2048_p1), 1536, %s1524_s12 }
  0x58   : > { %s927_s18 = sshll.u32 (%p2048_p1), %s1743_s21, 4  ;;  %s912_s3 = scalar_lea.sflag (%p2048_p1), [#allocation5], %s1733_s6  ;;  %s2093_s18 = int_to_ptr.vmem [resolvable:$true] %s927_s18 }
  0x59   : >> { %v286_v17 = vshrl.u32 %v285_v15, 23  ;;  %v289_v19 = vand.u32 8388607, %v282_v16  ;;  %v599_v63 = vshrl.u32 %v598_v50, 23  ;;  %vm283_vm14 = vcmp.le.f32.partialorder %v282_v16, 0.7853982  ;;  %s2091_s30 = scalar_lea.hbm (%p2048_p1), %s2143_s2, %s1130_s24 }
  0x5a   : >> { %v492_v16 = vmul.f32 %v1536_v13, %v1560_v7  ;;  %s1396_s5 = scalar_lea.vmem (%p2048_p1), %s2093_s18, 1536  ;;  %s1596_s7 = smov (%p2048_p1), [#allocation8]  }
  0x5b   : >> { %v1096_v18 = vadd.s32 4294967169, %v286_v17  ;;  %v290_v21 = vor.u32 8388608, %v289_v19  ;;  %p1397_p11 = scmp.ne.s32.totalorder (%p2048_p1), %s2093_s18, %s1396_s5  ;;  %s1400_s15 = sshll.u32 (%p2048_p1), %s1596_s7, 4  ;;  %s1401_s15 = int_to_ptr.vmem [resolvable:$false] %s1400_s15 }
  0x5c   : > { %s1402_s12 = scalar_lea.vmem (%p2048_p1), %s1401_s15, 3072  ;;  %p1403_p7 = scmp.lt.s32.totalorder (%p2048_p1), %s2093_s18, %s1401_s15 }
  0x5d   : >> { %v292_v20 = vadd.s32 1, %v1096_v18  ;;  %v330_v36 = vshll.u32 %v290_v21, 8  ;;  %v1104_v18 = vadd.s32 4294967169, %v599_v63  ;;  %p1398_p2 = pnand (%p2048_p1), %p1397_p11, %p1700_p13  ;;  %p1404_p4 = scmp.lt.s32.totalorder (%p2048_p1), %s1402_s12, %s1396_s5 }
  0x5f   : >> { %vm293_vm0 = vcmp.gt.s32.totalorder %v292_v20, 0  ;;  %p1399_p5 = pneg (%p2048_p1), %p1398_p2  ;;  %p1405_p6 = por (%p2048_p1), %p1404_p4, %p1403_p7 }
  0x60   : >> { %v294_v22 = vsel %vm293_vm0, %v292_v20, 0  ;;  %v605_v20 = vadd.s32 1, %v1104_v18  ;;  %vm374_vm0 = vweird.f32 %v1818_v14 }
  0x61   : >> { %v296_v23 = vand.u32 31, %v294_v22  ;;  %v295_v24 = vshrl.u32 %v294_v22, 5  ;;  %v595_v22 = vand.u32 2147483647, %v1830_v37  ;;  %p1406_p9 = pnand (%p2048_p1), %p1405_p6, %p1399_p5 }
  0x62   : >> { %vm606_vm6 = vcmp.gt.s32.totalorder %v605_v20, 0 }
  0x63   : >> { %v297_v25 = vsub.s32 32, %v296_v23  ;;  %v299_v27 = vshll.u32 %v1590_v26, %v296_v23  ;;  %v302_v29 = vshll.u32 %v1591_v28, %v296_v23  ;;  %v305_v31 = vshll.u32 %v1592_v30, %v296_v23 }
  0x64   : >> { %v308_v33 = vshll.u32 %v1593_v32, %v296_v23  ;;  %v311_v35 = vshll.u32 %v1594_v34, %v296_v23  ;;  %vm314_vm1 = vcmp.lt.s32.totalorder %v295_v24, 1  ;;  %vm315_vm2 = vcmp.lt.s32.totalorder %v295_v24, 2 }
  0x65   : >> { %v298_v38 = vshrl.u32 %v1590_v26, %v297_v25  ;;  %v300_v39 = vshrl.u32 %v1591_v28, %v297_v25  ;;  %v303_v40 = vshrl.u32 %v1592_v30, %v297_v25  ;;  %v306_v41 = vshrl.u32 %v1593_v32, %v297_v25 }
  0x66   : >> { %v309_v42 = vshrl.u32 %v1594_v34, %v297_v25  ;;  %v312_v44 = vshrl.u32 %v1595_v43, %v297_v25  ;;  %vm317_vm3 = vcmp.lt.s32.totalorder %v295_v24, 4  ;;  %vm316_vm4 = vcmp.lt.s32.totalorder %v295_v24, 3 }
  0x67   : >> { %v301_v45 = vor.u32 %v300_v39, %v299_v27  ;;  %v304_v46 = vor.u32 %v303_v40, %v302_v29  ;;  %v307_v47 = vor.u32 %v306_v41, %v305_v31  ;;  %v607_v24 = vsel %vm606_vm6, %v605_v20, 0 }
  0x68   : >> { %v310_v48 = vor.u32 %v309_v42, %v308_v33  ;;  %v313_v49 = vor.u32 %v312_v44, %v311_v35  ;;  %v609_v27 = vand.u32 31, %v607_v24  ;;  %v602_v29 = vand.u32 8388607, %v595_v22 }
  0x69   : >> { %v318_v51 = vsel %vm314_vm1, %v298_v38, %v301_v45  ;;  %v319_v52 = vsel %vm317_vm3, %v307_v47, 2102212464  ;;  %v322_v53 = vsel %vm314_vm1, %v301_v45, %v304_v46  ;;  %v326_v54 = vsel %vm314_vm1, %v304_v46, %v307_v47 }
  0x6a   : >> { %v320_v55 = vsel %vm316_vm4, %v304_v46, %v319_v52  ;;  %v323_v56 = vsel %vm317_vm3, %v310_v48, 920167782  ;;  %v327_v57 = vsel %vm317_vm3, %v313_v49, 1326507024  ;;  %v608_v31 = vshrl.u32 %v607_v24, 5 }
  0x6b   : >> { %v324_v58 = vsel %vm316_vm4, %v307_v47, %v323_v56  ;;  %v328_v59 = vsel %vm316_vm4, %v310_v48, %v327_v57  ;;  %v321_v60 = vsel %vm315_vm2, %v318_v51, %v320_v55  ;;  %v610_v35 = vsub.s32 32, %v609_v27 }
  0x6c   : >> { %v325_v61 = vsel %vm315_vm2, %v322_v53, %v324_v58  ;;  %v329_v62 = vsel %vm315_vm2, %v326_v54, %v328_v59  ;;  %v337_v19 = vmul.u32 %v330_v36, %v321_v60  ;;  %v615_v38 = vshll.u32 %v1591_v28, %v609_v27 }
  0x6d   : >> { %v1841_v0 = vmul.u32.u64.low %v330_v36, %v329_v62  ;;  %v1842_v1 = vmul.u32.u64.high %v330_v36, %v329_v62, %v1841_v0  ;;  %v1844_v15 = vmul.u32.u64.low %v330_v36, %v325_v61  ;;  %v1845_v17 = vmul.u32.u64.high %v330_v36, %v325_v61, %v1844_v15 }
  0x6e   : >> { %v612_v36 = vshll.u32 %v1590_v26, %v609_v27  ;;  %v618_v39 = vshll.u32 %v1592_v30, %v609_v27  ;;  %v621_v40 = vshll.u32 %v1593_v32, %v609_v27  ;;  %v624_v41 = vshll.u32 %v1594_v34, %v609_v27 }
  0x6f   : >> { %vm339_vm5 = vc.u32 %v1842_v1, %v1844_v15  ;;  %v340_v21 = vadd.s32 1, %v1845_v17  ;;  %v611_v44 = vshrl.u32 %v1590_v26, %v610_v35  ;;  %v613_v45 = vshrl.u32 %v1591_v28, %v610_v35 }
  0x70   : >> { %v616_v46 = vshrl.u32 %v1592_v30, %v610_v35  ;;  %v603_v47 = vor.u32 8388608, %v602_v29  ;;  %v619_v48 = vshrl.u32 %v1593_v32, %v610_v35  ;;  %v622_v49 = vshrl.u32 %v1594_v34, %v610_v35 }
  0x71   : >> { %v341_v23 = vsel %vm339_vm5, %v340_v21, %v1845_v17  ;;  %v625_v50 = vshrl.u32 %v1595_v43, %v610_v35  ;;  %v614_v52 = vor.u32 %v613_v45, %v612_v36  ;;  %vm627_vm7 = vcmp.lt.s32.totalorder %v608_v31, 1 }
  0x72   : >> { %v342_v25 = vadd.s32 %v341_v23, %v337_v19  ;;  %v617_v53 = vor.u32 %v616_v46, %v615_v38  ;;  %v620_v54 = vor.u32 %v619_v48, %v618_v39  ;;  %v623_v55 = vor.u32 %v622_v49, %v621_v40 }
  0x73   : >> { %v626_v56 = vor.u32 %v625_v50, %v624_v41  ;;  %vm629_vm8 = vcmp.lt.s32.totalorder %v608_v31, 3  ;;  %vm630_vm9 = vcmp.lt.s32.totalorder %v608_v31, 4  ;;  %v631_v26 = vsel %vm627_vm7, %v611_v44, %v614_v52 }
  0x74   : >> { %v343_v33 = vadd.s32 536870912, %v342_v25  ;;  %v632_v28 = vsel %vm630_vm9, %v620_v54, 2102212464  ;;  %v635_v30 = vsel %vm627_vm7, %v614_v52, %v617_v53  ;;  %v636_v32 = vsel %vm630_vm9, %v623_v55, 920167782 }
  0x75   : >> { %vm628_vm10 = vcmp.lt.s32.totalorder %v608_v31, 2  ;;  %v633_v34 = vsel %vm629_vm8, %v617_v53, %v632_v28  ;;  %v643_v43 = vshll.u32 %v603_v47, 8  ;;  %v637_v60 = vsel %vm629_vm8, %v620_v54, %v636_v32 }
  0x76   : >> { %v1860_v42 = vshrl.u32 %v343_v33, 30  ;;  %v634_v59 = vsel %vm628_vm10, %v631_v26, %v633_v34  ;;  %v639_v61 = vsel %vm627_vm7, %v617_v53, %v620_v54  ;;  %v640_v62 = vsel %vm630_vm9, %v626_v56, 1326507024 }
  0x77   : >> { %v638_v0 = vsel %vm628_vm10, %v635_v30, %v637_v60  ;;  %v641_v17 = vsel %vm629_vm8, %v623_v55, %v640_v62  ;;  %v338_v27 = vadd.s32 %v1844_v15, %v1842_v1  ;;  %v650_v35 = vmul.u32 %v643_v43, %v634_v59 }
  0x78   : >> { %v345_v51 = vshll.u32 %v1860_v42, 30  ;;  %v642_v19 = vsel %vm628_vm10, %v639_v61, %v641_v17  ;;  %v1874_v20 = vmul.u32.u64.low %v643_v43, %v638_v0  ;;  %v1875_v21 = vmul.u32.u64.high %v643_v43, %v638_v0, %v1874_v20 }
  0x79   : >> { %v368_v53 = vsub.s32 4, %v1860_v42  ;;  %v489_v32 = vmul.f32 %v1544_v11, %v1568_v5  ;;  %v1907_v61 = vmul.f32 %v1536_v13, %v1564_v6  ;;  %v1911_v62 = vmul.f32 %v1536_v13, %v1568_v5 }
  0x7a   : >> { %v346_v57 = vsub.s32 %v342_v25, %v345_v51  ;;  %v1877_v24 = vmul.u32.u64.low %v643_v43, %v642_v19  ;;  %v1878_v25 = vmul.u32.u64.high %v643_v43, %v642_v19, %v1877_v24  ;;  %v653_v29 = vadd.s32 1, %v1875_v21 }
  0x7b   : >> { %v369_v26 = vsel %vm284_vm13, %v368_v53, %v1860_v42  ;;  %v1903_v42 = vmul.f32 %v1540_v12, %v1560_v7  ;;  %v1915_v0 = vmul.f32 %v1544_v11, %v1560_v7  ;;  %v1919_v17 = vmul.f32 %v1544_v11, %v1564_v6 }
  0x7c   : >> { %v348_v58 = vsub.s32 0, %v346_v57  ;;  %v651_v39 = vadd.s32 %v1874_v20, %v1878_v25  ;;  %vm652_vm12 = vc.u32 %v1878_v25, %v1874_v20  ;;  %v371_v43 = vsel %vm283_vm14, 0, %v369_v26 }
  0x7d   : >> { %v654_v44 = vsel %vm652_vm12, %v653_v29, %v1875_v21  ;;  %v529_v19 = vmul.f32 %v1544_v11, %v1556_v8  ;;  %v530_v20 = vmul.f32 %v1540_v12, %v1552_v9  ;;  %v496_v29 = vsub.f32 %v1903_v42, %v1907_v61 }
  0x7e   : >> { %v1097_v63 = vmin.u32 %v348_v58, %v346_v57  ;;  %v655_v45 = vadd.s32 %v654_v44, %v650_v35  ;;  %v490_v58 = vmul.f32 %v1540_v12, %v1564_v6  ;;  %v532_v44 = vmul.f32 %v1536_v13, %v1548_v10 }
  0x7f   : >> { %vm1952_vm7 = vcmp.le.f32.partialorder %v595_v22, 0.7853982  ;;  %vm597_vm8 = vcmp.lt.s32.totalorder %v1830_v37, 0 }
  0x80   : >> { %v350_v18 = vclz %v1097_v63  ;;  %v656_v1 = vadd.s32 536870912, %v655_v45  ;;  %v491_v60 = vadd.f32 %v490_v58, %v489_v32  ;;  %v478_v63 = vadd.s32 3, %v371_v43 }
  0x82   : >> { %v1098_v23 = vadd.s32 4294967294, %v350_v18  ;;  %v1886_v49 = vshrl.u32 %v656_v1, 30  ;;  %v1923_v18 = vmul.f32 %v1540_v12, %v1568_v5  ;;  %v479_v35 = vand.u32 3, %v478_v63 }
  0x84   : >> { %vm1099_vm11 = vcmp.lt.s32.totalorder %v1098_v23, 0  ;;  %v658_v51 = vshll.u32 %v1886_v49, 30  ;;  %vm484_vm2 = vcmp.eq.s32.totalorder %v479_v35, 2  ;;  %vm481_vm4 = vcmp.eq.s32.totalorder %v479_v35, 0 }
  0x85   : >> { %v353_v33 = vsel %vm1099_vm11, 0, %v1098_v23  ;;  %vm480_vm6 = vcmp.lt.s32.totalorder %v479_v35, 2 }
  0x86   : >> { %v354_v36 = vsub.s32 32, %v353_v33  ;;  %v355_v31 = vshll.u32 %v346_v57, %v353_v33  ;;  %v358_v38 = vsub.s32 4294967266, %v353_v33  ;;  %v659_v54 = vsub.s32 %v655_v45, %v658_v51 }
  0x87   : >> { %v375_v33 = vand.u32 3, %v371_v43  ;;  %v534_v45 = vmul.f32 %v1540_v12, %v1548_v10 }
  0x88   : >> { %v356_v40 = vshrl.u32 %v338_v27, %v354_v36  ;;  %v359_v41 = vadd.s32 127, %v358_v38  ;;  %v661_v56 = vsub.s32 0, %v659_v54  ;;  %v493_v27 = vadd.f32 %v492_v16, %v491_v60 }
  0x89   : >> { %v499_v38 = vsub.f32 %v1911_v62, %v1915_v0  ;;  %vm380_vm1 = vcmp.eq.s32.totalorder %v375_v33, 2  ;;  %vm377_vm3 = vcmp.eq.s32.totalorder %v375_v33, 0  ;;  %vm376_vm5 = vcmp.lt.s32.totalorder %v375_v33, 2 }
  0x8a   : >> { %v357_v46 = vor.u32 %v356_v40, %v355_v31  ;;  %v360_v47 = vshll.u32 %v359_v41, 23  ;;  %v1105_v30 = vmin.u32 %v661_v56, %v659_v54  ;;  %v502_v40 = vsub.f32 %v1919_v17, %v1923_v18 }
  0x8b   : >> { %v531_v41 = vadd.f32 %v530_v20, %v529_v19  ;;  %v681_v17 = vsub.s32 4, %v1886_v49 }
  0x8c   : >> { %v361_v15 = vor.u32 4788187, %v360_v47  ;;  %v364_v48 = vcvt.s32.f32 %v357_v46  ;;  %v663_v34 = vclz %v1105_v30  ;;  %v535_v46 = vmul.f32 %v1536_v13, %v1552_v9 }
  0x8d   : >> { %v533_v56 = vadd.f32 %v532_v44, %v531_v41 }
  0x8e   : >> { %v362_v50 = vand.u32 2147483647, %v361_v15  ;;  %v1106_v59 = vadd.s32 4294967294, %v663_v34  ;;  %v538_v15 = vmul.f32 %v1544_v11, %v1548_v10  ;;  %v536_v32 = vsub.f32 %v534_v45, %v535_v46 }
  0x90   : >> { %v365_v52 = vmul.f32 %v364_v48, %v362_v50  ;;  %vm1107_vm15 = vcmp.lt.s32.totalorder %v1106_v59, 0  ;;  %v540_v48 = vmul.f32 %v1544_v11, %v1552_v9  ;;  %v541_v50 = vmul.f32 %v1540_v12, %v1556_v8 }
  0x91   : >> { %v666_v21 = vsel %vm1107_vm15, 0, %v1106_v59  ;;  %vm687_vm15 = vweird.f32 %v1830_v37 }
  0x92   : >> { %v366_v55 = vxor.u32 2147483648, %v365_v52  ;;  %v667_v23 = vsub.s32 32, %v666_v21  ;;  %v668_v24 = vshll.u32 %v659_v54, %v666_v21  ;;  %v671_v25 = vsub.s32 4294967266, %v666_v21 }
  0x93   : >> { %v542_v16 = vsub.f32 %v540_v48, %v541_v50 }
  0x94   : >> { %v367_v57 = vsel %vm284_vm13, %v366_v55, %v365_v52  ;;  %v669_v36 = vshrl.u32 %v651_v39, %v667_v23  ;;  %v672_v31 = vadd.s32 127, %v671_v25  ;;  %v537_v39 = vmul.f32 %v1536_v13, %v1556_v8 }
  0x95   : >> { %v370_v28 = vsel %vm283_vm14, %v1818_v14, %v367_v57 }
  0x96   : >> { %1318 = vcosq.f32 %v370_v28  ;;  %v670_v47 = vor.u32 %v669_v36, %v668_v24  ;;  %v673_v1 = vshll.u32 %v672_v31, 23  ;;  %v539_v58 = vsub.f32 %v537_v39, %v538_v15 }
  0x97   : >> { %1320 = vsinq.f32 %v370_v28 }
  0x98   : >> { %v674_v52 = vor.u32 4788187, %v673_v1  ;;  %v677_v53 = vcvt.s32.f32 %v670_v47 }
  0x9a   : >> { %v675_v26 = vand.u32 2147483647, %v674_v52 }
  0x9c   : >> { %v678_v59 = vmul.f32 %v677_v53, %v675_v26 }
  0x9e   : >> { %v679_v0 = vxor.u32 2147483648, %v678_v59 }
  0xa0   : >> { %v680_v50 = vsel %vm597_vm8, %v679_v0, %v678_v59 }
  0xa3   : >> { %v1319_v51 = vpop.eup %1318 }
  0xa4   : >> { %v1321_v54 = vpop.eup %1320  ;;  %v381_v55 = vxor.u32 2147483648, %v1319_v51 }
  0xa5   : >> { %v378_v57 = vxor.u32 2147483648, %v1321_v54 }
  0xa6   : >> { %v382_v28 = vsel %vm380_vm1, %v381_v55, %v1321_v54  ;;  %v486_v30 = vsel %vm484_vm2, %v381_v55, %v1321_v54 }
  0xa7   : >> { %v379_v34 = vsel %vm377_vm3, %v1319_v51, %v378_v57  ;;  %v483_v43 = vsel %vm481_vm4, %v1319_v51, %v378_v57 }
  0xa8   : >> { %v383_v60 = vsel %vm376_vm5, %v379_v34, %v382_v28  ;;  %v487_v42 = vsel %vm480_vm6, %v483_v43, %v486_v30 }
  0xa9   : >> { %v384_v62 = vsel %vm374_vm0, nan, %v383_v60  ;;  %v488_v63 = vsel %vm374_vm0, nan, %v487_v42 }
  0xaa   : >> { %v503_v18 = vsub.f32 1.0, %v384_v62  ;;  %v504_v19 = vmul.f32 %v1568_v5, %v384_v62  ;;  %v505_v20 = vmul.f32 %v496_v29, %v488_v63  ;;  %v510_v22 = vmul.f32 %v1564_v6, %v384_v62 }
  0xab   : >> { %v511_v21 = vmul.f32 %v499_v38, %v488_v63  ;;  %v515_v23 = vmul.f32 %v1560_v7, %v384_v62  ;;  %v516_v24 = vmul.f32 %v502_v40, %v488_v63  ;;  %v543_v25 = vmul.f32 %v1556_v8, %v384_v62 }
  0xac   : >> { %v506_v33 = vadd.f32 %v505_v20, %v504_v19  ;;  %v507_v35 = vmul.f32 %v503_v18, %v493_v27  ;;  %v544_v36 = vmul.f32 %v536_v32, %v488_v63  ;;  %v546_v14 = vmul.f32 %v533_v56, %v503_v18 }
  0xad   : >> { %v512_v31 = vadd.f32 %v511_v21, %v510_v22  ;;  %v517_v41 = vadd.f32 %v516_v24, %v515_v23  ;;  %v549_v44 = vmul.f32 %v1552_v9, %v384_v62  ;;  %v550_v45 = vmul.f32 %v539_v58, %v488_v63 }
  0xae   : >> { %v508_v5 = vmul.f32 %v1544_v11, %v507_v35  ;;  %v513_v29 = vmul.f32 %v1540_v12, %v507_v35  ;;  %v518_v6 = vmul.f32 %v1536_v13, %v507_v35  ;;  %v545_v38 = vadd.f32 %v544_v36, %v543_v25 }
  0xaf   : >> { %v547_v7 = vmul.f32 %v1544_v11, %v546_v14  ;;  %v551_v40 = vadd.f32 %v550_v45, %v549_v44  ;;  %v552_v8 = vmul.f32 %v1540_v12, %v546_v14  ;;  %v554_v27 = vmul.f32 %v1548_v10, %v384_v62 }
  0xb0   : >> { %v509_v46 = vadd.f32 %v508_v5, %v506_v33  ;;  %v514_v47 = vadd.f32 %v513_v29, %v512_v31  ;;  %v519_v1 = vadd.f32 %v518_v6, %v517_v41  ;;  %v555_v39 = vmul.f32 %v542_v16, %v488_v63 }
  0xb1   : >> { %v548_v9 = vadd.f32 %v547_v7, %v545_v38  ;;  %v553_v15 = vadd.f32 %v552_v8, %v551_v40  ;;  %v557_v48 = vmul.f32 %v1536_v13, %v546_v14  ;;  %v682_v10 = vsel %vm597_vm8, %v681_v17, %v1886_v49 }
  0xb2   : >> { %v520_v51 = vmul.f32 %v509_v46, %v509_v46  ;;  %v521_v52 = vmul.f32 %v514_v47, %v514_v47  ;;  %v523_v53 = vmul.f32 %v519_v1, %v519_v1  ;;  %v556_v11 = vadd.f32 %v555_v39, %v554_v27 }
  0xb3   : >> { %v559_v54 = vmul.f32 %v548_v9, %v548_v9  ;;  %v560_v55 = vmul.f32 %v553_v15, %v553_v15  ;;  %v683_v12 = vsel %vm1952_vm7, %v1830_v37, %v680_v50  ;;  %v684_v30 = vsel %vm1952_vm7, 0, %v682_v10 }
  0xb4   : >> { %v522_v56 = vadd.f32 %v521_v52, %v520_v51  ;;  %v558_v57 = vadd.f32 %v557_v48, %v556_v11  ;;  %1322 = vcosq.f32 %v683_v12  ;;  %v791_v58 = vadd.s32 3, %v684_v30 }
  0xb5   : >> { %v561_v13 = vadd.f32 %v560_v55, %v559_v54  ;;  %1324 = vsinq.f32 %v683_v12  ;;  %v688_v34 = vand.u32 3, %v684_v30 }
  0xb6   : >> { %v524_v26 = vadd.f32 %v523_v53, %v522_v56  ;;  %v562_v28 = vmul.f32 %v558_v57, %v558_v57  ;;  %v792_v49 = vand.u32 3, %v791_v58 }
  0xb7   : >> { %vm693_vm9 = vcmp.eq.s32.totalorder %v688_v34, 2  ;;  %vm690_vm11 = vcmp.eq.s32.totalorder %v688_v34, 0  ;;  %vm689_vm13 = vcmp.lt.s32.totalorder %v688_v34, 2 }
  0xb8   : >> { %1326 = vrsqrt.f32 %v524_v26  ;;  %v563_v32 = vadd.f32 %v562_v28, %v561_v13  ;;  %vm797_vm10 = vcmp.eq.s32.totalorder %v792_v49, 2  ;;  %vm794_vm12 = vcmp.eq.s32.totalorder %v792_v49, 0 }
  0xb9   : >> { %vm793_vm14 = vcmp.lt.s32.totalorder %v792_v49, 2 }
  0xba   : >> { %1328 = vrsqrt.f32 %v563_v32 }
  0xc1   : >> { %v1323_v43 = vpop.eup %1322 }
  0xc2   : >> { %v1325_v16 = vpop.eup %1324  ;;  %v694_v59 = vxor.u32 2147483648, %v1323_v43 }
  0xc3   : >> { %v691_v60 = vxor.u32 2147483648, %v1325_v16 }
  0xc4   : >> { %v695_v42 = vsel %vm693_vm9, %v694_v59, %v1325_v16  ;;  %v799_v62 = vsel %vm797_vm10, %v694_v59, %v1325_v16 }
  0xc5   : >> { %v1327_v61 = vpop.eup %1326  ;;  %v692_v63 = vsel %vm690_vm11, %v1323_v43, %v691_v60  ;;  %v796_v0 = vsel %vm794_vm12, %v1323_v43, %v691_v60 }
  0xc6   : >> { %v526_v17 = vmul.f32 %v1327_v61, %v509_v46  ;;  %v527_v18 = vmul.f32 %v1327_v61, %v514_v47  ;;  %v528_v19 = vmul.f32 %v1327_v61, %v519_v1  ;;  %v696_v20 = vsel %vm689_vm13, %v692_v63, %v695_v42 }
  0xc7   : >> { %v800_v22 = vsel %vm793_vm14, %v796_v0, %v799_v62  ;;  %v697_v25 = vsel %vm687_vm15, nan, %v696_v20  ;;  %v1329_v33 = vpop.eup %1328 }
  0xc8   : >> { %v573_v21 = vmul.f32 %v526_v17, %v526_v17  ;;  %v574_v23 = vmul.f32 %v527_v18, %v527_v18  ;;  %v576_v24 = vmul.f32 %v528_v19, %v528_v19  ;;  %v817_v35 = vmul.f32 %v697_v25, %v526_v17 }
  0xc9   : >> { %v823_v14 = vmul.f32 %v697_v25, %v527_v18  ;;  %v828_v31 = vmul.f32 %v697_v25, %v528_v19  ;;  %v565_v41 = vmul.f32 %v1329_v33, %v548_v9  ;;  %v566_v44 = vmul.f32 %v1329_v33, %v553_v15 }
  0xca   : >> { %v575_v36 = vadd.f32 %v574_v23, %v573_v21  ;;  %v567_v5 = vmul.f32 %v1329_v33, %v558_v57  ;;  %v801_v58 = vsel %vm687_vm15, nan, %v800_v22  ;;  %v816_v43 = vsub.f32 1.0, %v697_v25 }
  0xcb   : >> { %v568_v29 = vmul.f32 %v565_v41, %v526_v17  ;;  %v569_v6 = vmul.f32 %v566_v44, %v527_v18 }
  0xcc   : >> { %v577_v45 = vadd.f32 %v576_v24, %v575_v36  ;;  %v571_v7 = vmul.f32 %v567_v5, %v528_v19 }
  0xcd   : >> { %v570_v38 = vadd.f32 %v569_v6, %v568_v29 }
  0xce   : >> { %1330 = vrsqrt.f32 %v577_v45 }
  0xcf   : >> { %v572_v40 = vadd.f32 %v571_v7, %v570_v38 }
  0xdb   : >> { %v1331_v8 = vpop.eup %1330 }
  0xdc   : >> { %v579_v27 = vmul.f32 %v1331_v8, %v572_v40 }
  0xde   : >> { %v580_v46 = vmul.f32 %v579_v27, %v526_v17  ;;  %v582_v47 = vmul.f32 %v579_v27, %v527_v18  ;;  %v584_v1 = vmul.f32 %v579_v27, %v528_v19 }
  0xe0   : >> { %v581_v39 = vsub.f32 %v565_v41, %v580_v46  ;;  %v583_v48 = vsub.f32 %v566_v44, %v582_v47  ;;  %v585_v50 = vsub.f32 %v567_v5, %v584_v1 }
  0xe2   : >> { %v586_v51 = vmul.f32 %v581_v39, %v581_v39  ;;  %v587_v52 = vmul.f32 %v583_v48, %v583_v48  ;;  %v589_v9 = vmul.f32 %v585_v50, %v585_v50 }
  0xe4   : >> { %v588_v15 = vadd.f32 %v587_v52, %v586_v51 }
  0xe6   : >> { %v590_v53 = vadd.f32 %v589_v9, %v588_v15 }
  0xe8   : >> { %1332 = vrsqrt.f32 %v590_v53 }
  0xf5   : >> { %v1333_v11 = vpop.eup %1332 }
  0xf6   : >> { %v1987_v54 = vmul.f32 %v1333_v11, %v581_v39  ;;  %v1989_v55 = vmul.f32 %v1333_v11, %v583_v48  ;;  %v1991_v10 = vmul.f32 %v1333_v11, %v585_v50 }
  0xf8   : >> { %v802_v12 = vmul.f32 %v1987_v54, %v526_v17  ;;  %v803_v56 = vmul.f32 %v1989_v55, %v527_v18  ;;  %v805_v57 = vmul.f32 %v1991_v10, %v528_v19  ;;  %v807_v13 = vmul.f32 %v1989_v55, %v528_v19 }
  0xf9   : >> { %v808_v26 = vmul.f32 %v1991_v10, %v527_v18  ;;  %v810_v28 = vmul.f32 %v1991_v10, %v526_v17  ;;  %v811_v30 = vmul.f32 %v1987_v54, %v528_v19  ;;  %v813_v32 = vmul.f32 %v1987_v54, %v527_v18 }
  0xfa   : >> { %v804_v34 = vadd.f32 %v803_v56, %v802_v12  ;;  %v814_v49 = vmul.f32 %v1989_v55, %v526_v17 }
  0xfb   : >> { %v809_v16 = vsub.f32 %v807_v13, %v808_v26  ;;  %v812_v59 = vsub.f32 %v810_v28, %v811_v30 }
  0xfc   : >> { %v806_v60 = vadd.f32 %v805_v57, %v804_v34  ;;  %v815_v42 = vsub.f32 %v813_v32, %v814_v49 }
  0xfd   : >> { %v818_v62 = vmul.f32 %v809_v16, %v801_v58  ;;  %v824_v61 = vmul.f32 %v812_v59, %v801_v58 }
  0xfe   : >> { %v820_v63 = vmul.f32 %v816_v43, %v806_v60  ;;  %v829_v0 = vmul.f32 %v815_v42, %v801_v58 }
  0xff   : >> { %v819_v20 = vadd.f32 %v818_v62, %v817_v35  ;;  %v825_v19 = vadd.f32 %v824_v61, %v823_v14  ;;  %v275_v14 = vld [vmem:[%s1815_s27] sm:$0x1] }
 0x100   : >> { %v821_v18 = vmul.f32 %v820_v63, %v1987_v54  ;;  %v826_v37 = vmul.f32 %v820_v63, %v1989_v55  ;;  %v830_v22 = vadd.f32 %v829_v0, %v828_v31  ;;  %v831_v21 = vmul.f32 %v820_v63, %v1991_v10 }
 0x102   : >> { %v822_v17 = vadd.f32 %v821_v18, %v819_v20  ;;  %v827_v23 = vadd.f32 %v826_v37, %v825_v19  ;;  %v832_v24 = vadd.f32 %v831_v21, %v830_v22 }
 0x104   : >> { %v833_v25 = vmul.f32 %v822_v17, %v822_v17  ;;  %v834_v33 = vmul.f32 %v827_v23, %v827_v23  ;;  %v836_v36 = vmul.f32 %v832_v24, %v832_v24 }
 0x106   : >> { %v835_v41 = vadd.f32 %v834_v33, %v833_v25 }
 0x108   : >> { %v837_v44 = vadd.f32 %v836_v36, %v835_v41 }
 0x10a   : >> { %1334 = vrsqrt.f32 %v837_v44 }
 0x117   : >> { %v1335_v35 = vpop.eup %1334 }
 0x118   : >> { %v2008_v5 = vmul.f32 %v1335_v35, %v822_v17   ;;  %v2010_v6 = vmul.f32 %v1335_v35, %v827_v23   ;;  %v2012_v7 = vmul.f32 %v1335_v35, %v832_v24  }
 0x11a   : >> { %v2156_v45 = vmov %v2008_v5  ;;  %v2157_v29 = vmov %v2010_v6  ;;  %v2158_v31 = vmov %v2012_v7 }
 0x11b   : >> { %v842_v38 = vmul.f32 %v2156_v45, %v1987_v54  ;;  %v843_v40 = vmul.f32 %v2157_v29, %v1989_v55  ;;  %v845_v8 = vmul.f32 %v2158_v31, %v1991_v10  ;;  %v847_v27 = vmul.f32 %v2156_v45, %v2156_v45  ;;  %902 = vst [vmem:[#allocation2 + $0x3] sm:$0x1] (%p2048_p1), %v2156_v45 }
 0x11c   : >> { %v848_v46 = vmul.f32 %v2157_v29, %v2157_v29  ;;  %v850_v5 = vmul.f32 %v2158_v31, %v2158_v31  ;;  %v887_v6 = vmul.f32 %v2156_v45, %v275_v14  ;;  %v889_v7 = vmul.f32 %v2157_v29, %v275_v14  ;;  %903 = vst [vmem:[#allocation2 + $0x4] sm:$0x1] (%p2048_p1), %v2157_v29 }
 0x11d   : >> { %v844_v47 = vadd.f32 %v843_v40, %v842_v38  ;;  %v891_v1 = vmul.f32 %v2158_v31, %v275_v14  ;;  %904 = vst [vmem:[#allocation2 + $0x5] sm:$0x1] (%p2048_p1), %v2158_v31 }
 0x11e   : >> { %v849_v39 = vadd.f32 %v848_v46, %v847_v27  ;;  %v888_v48 = vadd.f32 %v1580_v2, %v887_v6   ;;  %v890_v50 = vadd.f32 %v1576_v3, %v889_v7   ;;  %v2166_v7 = vmov %v2158_v31 }
 0x11f   : >> { %v846_v51 = vadd.f32 %v845_v8, %v844_v47  ;;  %v892_v52 = vadd.f32 %v1572_v4, %v891_v1   ;;  %v2167_v6 = vmov %v2157_v29 }
 0x120   : >> { %v851_v9 = vadd.f32 %v850_v5, %v849_v39  ;;  %894 = vst [vmem:[%s893_s28] sm:$0x1] %v888_v48  ;;  %1112 = vst [vmem:[%s893_s28 + $0x1] sm:$0x1] %v890_v50  ;;  %v2168_v5 = vmov %v2156_v45 }
 0x121   : >> { %1113 = vst [vmem:[%s893_s28 + $0x2] sm:$0x1] %v892_v52  ;;  %899 = vst [vmem:[#allocation2] sm:$0x1] (%p2048_p1), %v888_v48 }
 0x122   : >> { %1336 = vrsqrt.f32 %v851_v9  ;;  %900 = vst [vmem:[#allocation2 + $0x1] sm:$0x1] (%p2048_p1), %v890_v50  ;;  %901 = vst [vmem:[#allocation2 + $0x2] sm:$0x1] (%p2048_p1), %v892_v52 }
 0x12f   : >> { %v1337_v15 = vpop.eup %1336 }
 0x130   : >> { %v853_v53 = vmul.f32 %v1337_v15, %v846_v51 }
 0x132   : >> { %v854_v11 = vmul.f32 %v853_v53, %v2156_v45  ;;  %v856_v12 = vmul.f32 %v853_v53, %v2157_v29  ;;  %v858_v56 = vmul.f32 %v853_v53, %v2158_v31 }
 0x134   : >> { %v855_v2 = vsub.f32 %v1987_v54, %v854_v11  ;;  %v857_v3 = vsub.f32 %v1989_v55, %v856_v12  ;;  %v859_v57 = vsub.f32 %v1991_v10, %v858_v56 }
 0x136   : >> { %v860_v4 = vmul.f32 %v855_v2, %v855_v2  ;;  %v861_v13 = vmul.f32 %v857_v3, %v857_v3  ;;  %v863_v26 = vmul.f32 %v859_v57, %v859_v57 }
 0x138   : >> { %v862_v28 = vadd.f32 %v861_v13, %v860_v4  ;;  %v2169_v4 = vmov %v892_v52 }
 0x13a   : >> { %v864_v30 = vadd.f32 %v863_v26, %v862_v28 }
 0x13c   : >> { %1338 = vrsqrt.f32 %v864_v30 }
 0x149   : >> { %v1339_v32 = vpop.eup %1338 }
 0x14a   : >> { %v866_v58 = vmul.f32 %v1339_v32, %v855_v2   ;;  %v867_v34 = vmul.f32 %v1339_v32, %v857_v3   ;;  %v868_v49 = vmul.f32 %v1339_v32, %v859_v57   ;;  %v2170_v3 = vmov %v890_v50 }
 0x14b   : >> { %v2171_v2 = vmov %v888_v48 }
 0x14c   : >> { %v869_v43 = vmul.f32 %v868_v49, %v2157_v29  ;;  %v870_v16 = vmul.f32 %v867_v34, %v2158_v31  ;;  %v872_v54 = vmul.f32 %v866_v58, %v2158_v31  ;;  %v873_v55 = vmul.f32 %v868_v49, %v2156_v45  ;;  %905 = vst [vmem:[#allocation2 + $0x6] sm:$0x1] (%p2048_p1), %v866_v58 }
 0x14d   : >> { %v875_v10 = vmul.f32 %v867_v34, %v2156_v45  ;;  %v876_v59 = vmul.f32 %v866_v58, %v2157_v29  ;;  %v2164_v9 = vmov %v867_v34  ;;  %v2165_v8 = vmov %v866_v58  ;;  %906 = vst [vmem:[#allocation2 + $0x7] sm:$0x1] (%p2048_p1), %v867_v34  ;;  %907 = vst [vmem:[#allocation2 + $0x8] sm:$0x1] (%p2048_p1), %v868_v49 }
 0x14e   : >> { %v871_v60 = vsub.f32 %v869_v43, %v870_v16  ;;  %v874_v42 = vsub.f32 %v872_v54, %v873_v55 }
 0x14f   : >> { %v877_v62 = vsub.f32 %v875_v10, %v876_v59  ;;  %v2163_v10 = vmov %v868_v49 }
 0x150   : >> { %v878_v61 = vmul.f32 %v871_v60, %v871_v60  ;;  %v879_v63 = vmul.f32 %v874_v42, %v874_v42 }
 0x151   : >> { %v881_v0 = vmul.f32 %v877_v62, %v877_v62 }
 0x152   : >> { %v880_v20 = vadd.f32 %v879_v63, %v878_v61 }
 0x154   : >> { %v882_v19 = vadd.f32 %v881_v0, %v880_v20 }
 0x156   : >> { %1340 = vrsqrt.f32 %v882_v19 }
 0x162   : > { %259 = sbr.rel (!%p2048_p1) target bundleno = 83 (0x53), region = 107 }
 0x163   : >> { %v1341_v18 = vpop.eup %1340 }
 0x164   : >> { %v884_v37 = vmul.f32 %v1341_v18, %v871_v60   ;;  %v885_v22 = vmul.f32 %v1341_v18, %v874_v42   ;;  %v886_v21 = vmul.f32 %v1341_v18, %v877_v62  }
 0x166   : >> { %v2160_v13 = vmov %v886_v21  ;;  %v2161_v12 = vmov %v885_v22  ;;  %v2162_v11 = vmov %v884_v37  ;;  %908 = vst [vmem:[#allocation2 + $0x9] sm:$0x1] (%p2048_p1), %v884_v37  ;;  %909 = vst [vmem:[#allocation2 + $0xa] sm:$0x1] (%p2048_p1), %v885_v22 }
 0x167   : > { %910 = vst [vmem:[#allocation2 + $0xb] sm:$0x1] %v886_v21 }
 0x168   : > { %1409 = shalt.err (!%p1406_p9)
}
 0x169   : > { %s1410_s16 = scalar_lea.hbm %s2091_s30, 1536  ;;  %s1414_s17 = scalar_lea.hbm %s2143_s2, 3072 }
 0x16a   : > { %p1411_p12 = scmp.ne.s32.totalorder %s2091_s30, %s1410_s16  ;;  %p1415_p8 = scmp.lt.s32.totalorder %s2091_s30, %s2143_s2 }
 0x16b   : > { %p1416_p1 = scmp.lt.s32.totalorder %s1414_s17, %s1410_s16 }
 0x16c   : > { %p1412_p0 = pnand %p1411_p12, %p1700_p13 }
 0x16d   : > { %p1417_p11 = por %p1416_p1, %p1415_p8 }
 0x16e   : > { %p1413_p3 = pneg %p1412_p0 }
 0x170   : > { %p1418_p2 = pnand %p1417_p11, %p1413_p3 }
 0x172   : > { %1421 = shalt.err (!%p1418_p2)
}
 0x173   : > { %s1597_s28 = smov 16   ;;  %s1598_s22 = smov 1  }
 0x174   : > { %1137 = dma.vmem_to_hbm [thread:$0]  (%p1700_p13), %s2093_s18, 1536, %s2091_s30, %s912_s3, %s1597_s28, %s1597_s28, %s1598_s22  }
 0x175 PF: > { %s942_s24 = sand.u32 1, %s1512_s9   ;;  %p2172_p5 = scmp.ne.s32.totalorder %s2148_s20, 0 }
 0x176   : > { %s943_s26 = scalar_lea.sflag [#allocation5], %s942_s24 }
 0x177   : > { %p1148_p7 = pnand %p1087_p10, %p2172_p5 }
 0x179   : > { %p1149_p4 = pneg %p1148_p7 }
 0x17b   : > { %1507 = dma.done.wait (%p1149_p4), %s943_s26, 1536  }
 0x17c   : > { %1509 = vsyncadd (%p1149_p4), %s943_s26, 4294965760  ;;  %s19_s14 = sadd.s32 1, %s1532_s14   ;;  %s2173_s9 = smov %s1516_s10 }
 0x17d   : > { %p16_p6 = scmp.ge.s32.totalorder %s19_s14, 4   ;;  %s2174_s10 = smov %s1520_s11 }
 0x17e   : > { %s2175_s11 = smov %s1709_s8  ;;  %s2176_s12 = smov %s1528_s13 }
 0x17f   : > { %s2177_s13 = smov %s2179_s25  ;;  %18 = sbr.rel (!%p16_p6) target bundleno = 7 (0x7), region = 118 }
 0x184   :  { %948 = vsyncpa [#allocation4], 1 }
 0x185   :  { %950 = vsyncpa [#allocation4 + $0x1], 1 }
 0x186   :  { %951 = vsyncpa [#allocation7], 1 }
 0x187   :  { %953 = vsyncpa [#allocation7 + $0x1], 1 }
 0x188   :  { %954 = vsyncpa [#allocation5], 1 }
 0x189   :  { %956 = vsyncpa [#allocation5 + $0x1], 1 }

</bundles_post_ra>
